<compile_context>
chip_gen: v7x
topology: tpu7x:2x2x1
jax: 0.10.0
libtpu: 0.0.40
codegen_flags: <defaults>
</compile_context>

<pallas_src>
import math
import numpy as np

import jax
import jax.numpy as jnp
from jax import lax
from jax.experimental import pallas as pl
from jax.experimental.pallas import tpu as pltpu


# -----------------------------------------------------------------------------
# Kernel: one cross-attention branch.
# -----------------------------------------------------------------------------
def _dual_cma_branch_kernel(kqt_ref, kc_ref, wl_ref, bl_ref, vt_ref,
                            out_ref, logits_scr):
    """One branch of the dual cross-modal attention.

      kqt_ref   : (1, TN, 64)   bf16  query-side fused keys (transposed), one tile
      kc_ref    : (1, 64, TK)   bf16  k-th slab of the context-side fused keys
      wl_ref    : (TK, Ncp)     bf16  k-th slab of the (Nc, Nc) linear weight, (in, out)
      bl_ref    : (1, Ncp)      f32   linear bias (padded columns = -1e30 -> masked)
      vt_ref    : (1, Ncp, Cq)  bf16  gamma-folded value projection, transposed
      out_ref   : (1, TN, Cq)   f32   out^T tile = softmax(energy @ Wl + bl) @ V^T
      logits_scr: (TN, Ncp)     f32   accumulator for the blocked linear contraction
    """
    k = pl.program_id(2)
    nk = pl.num_programs(2)

    # (TN, TK) energy slab and its partial (TN, Ncp) linear contribution (MXU, f32 acc).
    e_slab = jnp.dot(kqt_ref[0], kc_ref[0], preferred_element_type=jnp.float32)
    part = jnp.dot(e_slab.astype(jnp.bfloat16), wl_ref[...],
                   preferred_element_type=jnp.float32)

    @pl.when(k == 0)
    def _first():                       # assign: no zero-init + RMW on the first slab
        logits_scr[...] = part

    @pl.when(k > 0)
    def _accumulate():
        logits_scr[...] += part

    @pl.when(k == nk - 1)
    def _finalize():
        logits = logits_scr[...] + bl_ref[...]                       # f32
        m = jnp.max(logits, axis=-1, keepdims=True)
        e = jnp.exp(logits - m)
        inv = pl.reciprocal(jnp.sum(e, axis=-1, keepdims=True), approx=True)
        att = (e * inv).astype(jnp.bfloat16)                         # (TN, Ncp)
        # out^T = att @ V^T : canonical last-with-first contraction, no transposes.
        out_ref[0] = jnp.dot(att, vt_ref[0], preferred_element_type=jnp.float32)


# -----------------------------------------------------------------------------
# Wrapper helpers: padding, VMEM budgeting, tile selection.
# -----------------------------------------------------------------------------
def _round_up(n, m=128):
    return ((n + m - 1) // m) * m


def _pad_axis(a, axis, new_size, value=0.0):
    pad = new_size - a.shape[axis]
    if pad == 0:
        return a
    widths = [(0, 0)] * a.ndim
    widths[axis] = (0, pad)
    return jnp.pad(a, widths, constant_values=value)


def _vmem_capacity_bytes():
    try:
        return int(pltpu.get_tpu_info().vmem_capacity_bytes)
    except Exception:
        return 64 << 20            # conservative fallback (v7x-sized)


def _vmem_estimate(tn, tk, Ncp, Cq, kch=64):
    """Rough double-buffered working-set estimate for one branch call."""
    est = 0
    est += 2 * tn * kch * 2        # query keys^T block (bf16)
    est += 2 * kch * tk * 2        # context keys slab (bf16)
    est += 2 * tk * Ncp * 2        # linear weight slab (bf16) -- dominant stream
    est += 2 * Ncp * 4             # linear bias
    est += 2 * Ncp * Cq * 2        # values^T block (bf16, resident per batch)
    est += 2 * tn * Cq * 4         # out^T tile
    est += tn * Ncp * 4            # logits accumulator scratch (f32)
    est += int(2.5 * tn * Ncp * 4) # finalize temporaries (exp / att)
    est += 2 << 20                 # misc headroom
    return est


def _divisor_tiles(n, unit=128):
    """Multiples of `unit` that divide n, descending (n is a multiple of unit)."""
    return [t for t in range(n, 0, -unit) if n % t == 0]


def _pick_tiles(B, Nqp, Ncp, Cq, max_tn, max_tk, budget):
    tn_all = [t for t in _divisor_tiles(Nqp) if t <= max(max_tn, 128)] or [128]
    tk_all = [t for t in _divisor_tiles(Ncp) if t <= max(max_tk, 128)] or [128]
    # Megacore: keep at least 2 "parallel" grid steps so both TensorCores get work.
    tn_opts = [t for t in tn_all if B * (Nqp // t) >= 2] or tn_all
    for tn in tn_opts:             # prefer large TN (arithmetic intensity on wl stream)
        for tk in tk_all:          # then the largest TK that still fits the budget
            if _vmem_estimate(tn, tk, Ncp, Cq) <= budget:
                return tn, tk
    return tn_opts[-1], tk_all[-1]


# -----------------------------------------------------------------------------
# One branch: out^T = softmax((kq^T kc) @ Wl + bl) @ V^T, returned as (B, Nqp, Cq) f32.
# -----------------------------------------------------------------------------
def _attend_one_side(kqt, kc, wl, bl, vt, *, max_tile_n, max_tile_k):
    B, Nqp, kch = kqt.shape
    _, _, Ncp = kc.shape
    Cq = vt.shape[-1]

    cap = _vmem_capacity_bytes()
    budget = max(cap - (16 << 20), 16 << 20)
    tn, tk = _pick_tiles(B, Nqp, Ncp, Cq, max_tile_n, max_tile_k, budget)
    grid = (B, Nqp // tn, Ncp // tk)

    est = _vmem_estimate(tn, tk, Ncp, Cq)
    # Generous but always below physical VMEM (v7x: 64 MiB; v5e/v6e: 128 MiB).
    vmem_limit = int(min(cap - (2 << 20), max(2 * est, 32 << 20)))

    return pl.pallas_call(
        _dual_cma_branch_kernel,
        out_shape=jax.ShapeDtypeStruct((B, Nqp, Cq), jnp.float32),
        grid=grid,
        in_specs=[
            pl.BlockSpec((1, tn, kch), lambda b, i, k: (b, i, 0)),   # query keys^T tile
            pl.BlockSpec((1, kch, tk), lambda b, i, k: (b, 0, k)),   # context keys slab
            pl.BlockSpec((tk, Ncp),    lambda b, i, k: (k, 0)),      # linear weight slab
            pl.BlockSpec((1, Ncp),     lambda b, i, k: (0, 0)),      # linear bias
            pl.BlockSpec((1, Ncp, Cq), lambda b, i, k: (b, 0, 0)),   # values^T (per-b resident)
        ],
        out_specs=pl.BlockSpec((1, tn, Cq), lambda b, i, k: (b, i, 0)),
        scratch_shapes=[pltpu.VMEM((tn, Ncp), jnp.float32)],
        compiler_params=pltpu.CompilerParams(
            dimension_semantics=("parallel", "parallel", "arbitrary"),
            vmem_limit_bytes=vmem_limit),
    )(kqt, kc, wl, bl, vt)


# -----------------------------------------------------------------------------
# Full forward
# -----------------------------------------------------------------------------
def dual_cross_modal_attention(x_nchw, y_nchw, params, *, max_tile_n=1024, max_tile_k=2048):
    """x_nchw: (B, C1, H1, W1), y_nchw: (B, C2, H2, W2) -> (out_x, out_y) in NCHW."""
    B, C1, H1, W1 = x_nchw.shape
    B2, C2, H2, W2 = y_nchw.shape
    assert B == B2
    N1, N2 = H1 * W1, H2 * W2
    N1p, N2p = _round_up(N1), _round_up(N2)

    f32, bf16 = jnp.float32, jnp.bfloat16
    hi = lax.Precision.HIGHEST
    mm = lambda a, b: jnp.matmul(a, b, precision=hi)

    # NCHW -> (B, C, N): pure reshape; the spatial axis maps to the TPU lane dim.
    x = x_nchw.reshape(B, C1, N1).astype(f32)
    y = y_nchw.reshape(B, C2, N2).astype(f32)

    # Fold key_conv_share into key_conv1 / key_conv2 (exact algebra).
    wk1f = mm(params["wks"], params["wk1"])                                   # (64, C1)
    bk1f = mm(params["wks"], params["bk1"]) + params["bks"]                   # (64,)
    wk2f = mm(params["wks"], params["wk2"])                                   # (64, C2)
    bk2f = mm(params["wks"], params["bk2"]) + params["bks"]

    # Tiny projections done once in the wrapper (per perf review): keys & gamma-folded values.
    def conv1x1(w, b, inp):                                                   # (B, out, N)
        return jnp.einsum("oc,bcn->bon", w, inp, precision=hi) + b[None, :, None]

    k1 = conv1x1(wk1f, bk1f, x)                                               # (B, 64, N1)
    k2 = conv1x1(wk2f, bk2f, y)                                               # (B, 64, N2)
    g1 = jnp.asarray(params["gamma1"], f32)
    g2 = jnp.asarray(params["gamma2"], f32)
    v2 = g1 * conv1x1(params["wv2"], params["bv2"], y)                        # (B, C1, N2)
    v1 = g2 * conv1x1(params["wv1"], params["bv1"], x)                        # (B, C2, N1)

    NEG = -1e30   # masks padded softmax columns exactly (exp underflows to 0)

    # Branch A (out_x): queries = x-side (N1), context = y-side (N2).
    kqt_a = _pad_axis(jnp.swapaxes(k1, 1, 2), 1, N1p).astype(bf16)            # (B, N1p, 64)
    kc_a = _pad_axis(k2, 2, N2p).astype(bf16)                                 # (B, 64, N2p)
    wl_a = _pad_axis(_pad_axis(params["wl1"].T, 0, N2p), 1, N2p).astype(bf16)  # (N2p, N2p) (in,out)
    bl_a = _pad_axis(params["bl1"].reshape(1, -1).astype(f32), 1, N2p, NEG)   # (1, N2p)
    vt_a = _pad_axis(jnp.swapaxes(v2, 1, 2), 1, N2p).astype(bf16)             # (B, N2p, C1)

    # Branch B (out_y): queries = y-side (N2), context = x-side (N1)  -> energy^T for free.
    kqt_b = _pad_axis(jnp.swapaxes(k2, 1, 2), 1, N2p).astype(bf16)            # (B, N2p, 64)
    kc_b = _pad_axis(k1, 2, N1p).astype(bf16)                                 # (B, 64, N1p)
    wl_b = _pad_axis(_pad_axis(params["wl2"].T, 0, N1p), 1, N1p).astype(bf16)
    bl_b = _pad_axis(params["bl2"].reshape(1, -1).astype(f32), 1, N1p, NEG)
    vt_b = _pad_axis(jnp.swapaxes(v1, 1, 2), 1, N1p).astype(bf16)             # (B, N1p, C2)

    outT_x = _attend_one_side(kqt_a, kc_a, wl_a, bl_a, vt_a,
                              max_tile_n=max_tile_n, max_tile_k=max_tile_k)   # (B, N1p, C1)
    outT_y = _attend_one_side(kqt_b, kc_b, wl_b, bl_b, vt_b,
                              max_tile_n=max_tile_n, max_tile_k=max_tile_k)   # (B, N2p, C2)

    # Layout restore + residual in the caller's dtype (wrapper-side layout plumbing).
    out_x = (jnp.swapaxes(outT_x[:, :N1, :], 1, 2) + x).reshape(B, C1, H1, W1)
    out_y = (jnp.swapaxes(outT_y[:, :N2, :], 1, 2) + y).reshape(B, C2, H2, W2)
    return out_x.astype(x_nchw.dtype), out_y.astype(y_nchw.dtype)


# -----------------------------------------------------------------------------
# Deterministic parameter init (shapes match the module's __init__).
# Conv/Linear weights: xavier_normal_(gain=0.02); biases: torch default uniform.
# Weights stored in PyTorch layout: conv (out, in), linear (out, in).
# -----------------------------------------------------------------------------
def init_params(key, xdim, ydim, xsize, ysize, out_channels=64):
    def xavier_normal(k, fan_out, fan_in, gain=0.02):
        std = gain * math.sqrt(2.0 / (fan_in + fan_out))
        return std * jax.random.normal(k, (fan_out, fan_in), dtype=jnp.float32)

    def bias_uniform(k, fan_in, n):
        bound = 1.0 / math.sqrt(fan_in)
        return jax.random.uniform(k, (n,), dtype=jnp.float32, minval=-bound, maxval=bound)

    ks = jax.random.split(key, 14)
    n1, n2 = xsize * xsize, ysize * ysize
    return {
        "wk1": xavier_normal(ks[0], out_channels, xdim),
        "bk1": bias_uniform(ks[1], xdim, out_channels),
        "wk2": xavier_normal(ks[2], out_channels, ydim),
        "bk2": bias_uniform(ks[3], ydim, out_channels),
        "wks": xavier_normal(ks[4], out_channels, out_channels),
        "bks": bias_uniform(ks[5], out_channels, out_channels),
        "wl1": xavier_normal(ks[6], n2, n2),
        "bl1": bias_uniform(ks[7], n2, n2),
        "wl2": xavier_normal(ks[8], n1, n1),
        "bl2": bias_uniform(ks[9], n1, n1),
        "wv1": xavier_normal(ks[10], ydim, xdim),
        "bv1": bias_uniform(ks[11], xdim, ydim),
        "wv2": xavier_normal(ks[12], xdim, ydim),
        "bv2": bias_uniform(ks[13], ydim, xdim),
        # PyTorch initializes gamma to 0; 0.1 here so the attention path is actually
        # exercised by the synthetic test (noted: not parity with the module's init).
        "gamma1": jnp.asarray(0.1, dtype=jnp.float32),
        "gamma2": jnp.asarray(0.1, dtype=jnp.float32),
    }


# -----------------------------------------------------------------------------
# Pure-JAX f32 reference (mirrors the PyTorch NCHW forward, unfused weights)
# -----------------------------------------------------------------------------
def reference_forward(x, y, p):
    B, C1, H1, W1 = x.shape
    _, C2, H2, W2 = y.shape
    N1, N2 = H1 * W1, H2 * W2
    hi = jax.lax.Precision.HIGHEST

    def conv1x1(inp, w, b):  # w: (out, in), b: (out,)
        return jnp.einsum("oc,bchw->bohw", w, inp, precision=hi) + b.reshape(1, -1, 1, 1)

    pk1 = conv1x1(conv1x1(x, p["wk1"], p["bk1"]), p["wks"], p["bks"])
    pk1 = pk1.reshape(B, -1, N1).transpose(0, 2, 1)                           # (B, N1, 64)
    pk2 = conv1x1(conv1x1(y, p["wk2"], p["bk2"]), p["wks"], p["bks"]).reshape(B, -1, N2)
    energy = jnp.matmul(pk1, pk2, precision=hi)                               # (B, N1, N2)

    att1 = jax.nn.softmax(jnp.matmul(energy, p["wl1"].T, precision=hi) + p["bl1"], axis=-1)
    att2 = jax.nn.softmax(
        jnp.matmul(energy.transpose(0, 2, 1), p["wl2"].T, precision=hi) + p["bl2"], axis=-1)

    pv2 = conv1x1(y, p["wv2"], p["bv2"]).reshape(B, C1, N2)
    out_x = p["gamma1"] * jnp.matmul(pv2, att1.transpose(0, 2, 1),
                                     precision=hi).reshape(B, C1, H1, W1) + x
    pv1 = conv1x1(x, p["wv1"], p["bv1"]).reshape(B, C2, N1)
    out_y = p["gamma2"] * jnp.matmul(pv1, att2.transpose(0, 2, 1),
                                     precision=hi).reshape(B, C2, H2, W2) + y
    return out_x, out_y


# -----------------------------------------------------------------------------
def _run_case(key, B, xdim, ydim, xsize, ysize, **tile_kwargs):
    kx, ky, kp = jax.random.split(key, 3)
    x = jax.random.normal(kx, (B, xdim, xsize, xsize), dtype=jnp.float32)
    y = jax.random.normal(ky, (B, ydim, ysize, ysize), dtype=jnp.float32)
    params = init_params(kp, xdim, ydim, xsize, ysize)

    out_x, out_y = dual_cross_modal_attention(x, y, params, **tile_kwargs)
    out_x = jax.block_until_ready(out_x)
    out_y = jax.block_until_ready(out_y)

    ref_x, ref_y = reference_forward(x, y, params)
    np.testing.assert_allclose(np.asarray(out_x), np.asarray(ref_x), rtol=2e-3, atol=2e-3)
    np.testing.assert_allclose(np.asarray(out_y), np.asarray(ref_y), rtol=2e-3, atol=2e-3)


if __name__ == "__main__":
    key = jax.random.PRNGKey(0)
    ka, kb, kc = jax.random.split(key, 3)

    # Case 1: module-default spatial size (16x16 -> N=256), default (budget-chosen) tiles.
    _run_case(ka, B=2, xdim=4, ydim=6, xsize=16, ysize=16)
    # Case 2: forced small tiles so the K-blocked accumulator / multi-tile path is exercised.
    _run_case(kb, B=2, xdim=4, ydim=6, xsize=16, ysize=16, max_tile_n=128, max_tile_k=128)
    # Case 3: non-multiple-of-128 spatial size (12x12 -> N=144) exercising the padding/masking path.
    _run_case(kc, B=2, xdim=4, ydim=6, xsize=16, ysize=12)

    print("KERNEL_OK")
</pallas_src>

<mosaic_0001>
module attributes {stable_mosaic.version = 11 : i64} {
  func.func @_dual_cma_branch_kernel(%arg0: i32, %arg1: i32, %arg2: i32, %arg3: memref<1x256x64xbf16, #tpu.memory_space<vmem>>, %arg4: memref<1x64x256xbf16, #tpu.memory_space<vmem>>, %arg5: memref<256x256xbf16, #tpu.memory_space<vmem>>, %arg6: memref<1x256xf32, #tpu.memory_space<vmem>>, %arg7: memref<1x256x4xbf16, #tpu.memory_space<vmem>>, %arg8: memref<1x256x4xf32, #tpu.memory_space<vmem>>, %arg9: memref<256x256xf32, #tpu.memory_space<vmem>>) attributes {dimension_semantics = [#tpu.dimension_semantics<parallel>, #tpu.dimension_semantics<parallel>, #tpu.dimension_semantics<arbitrary>], iteration_bounds = array<i64: 2, 1, 1>, scalar_prefetch = 0 : i64, scratch_operands = 1 : i64, tpu.core_type = #tpu.core_type<tc>, window_params = [{transform_indices = @transform_0, window_bounds = array<i64: 1, 256, 64>}, {transform_indices = @transform_1, window_bounds = array<i64: 1, 64, 256>}, {transform_indices = @transform_2, window_bounds = array<i64: 256, 256>}, {pipeline_mode = #tpu.pipeline_mode<synchronous>, transform_indices = @transform_3, window_bounds = array<i64: 1, 256>}, {transform_indices = @transform_4, window_bounds = array<i64: 1, 256, 4>}, {transform_indices = @transform_5, window_bounds = array<i64: 1, 256, 4>}]} {
    %c0 = arith.constant 0 : index
    %c0_0 = arith.constant 0 : index
    %c0_1 = arith.constant 0 : index
    %0 = vector.load %arg3[%c0, %c0_0, %c0_1] : memref<1x256x64xbf16, #tpu.memory_space<vmem>>, vector<1x256x64xbf16>
    %1 = vector.shape_cast %0 : vector<1x256x64xbf16> to vector<256x64xbf16>
    %c0_2 = arith.constant 0 : index
    %c0_3 = arith.constant 0 : index
    %c0_4 = arith.constant 0 : index
    %2 = vector.load %arg4[%c0_2, %c0_3, %c0_4] : memref<1x64x256xbf16, #tpu.memory_space<vmem>>, vector<1x64x256xbf16>
    %3 = vector.shape_cast %2 : vector<1x64x256xbf16> to vector<64x256xbf16>
    %cst = arith.constant dense<0.000000e+00> : vector<256x256xf32>
    %4 = tpu.matmul %1, %3, %cst {dimension_numbers = #tpu.dot_dimension_numbers<[1], [0], [0], [1], [0, 0, 1, 1], [], []>} : vector<256x64xbf16>, vector<64x256xbf16>, vector<256x256xf32> -> vector<256x256xf32>
    %5 = arith.truncf %4 : vector<256x256xf32> to vector<256x256xbf16>
    %c0_5 = arith.constant 0 : index
    %c0_6 = arith.constant 0 : index
    %6 = vector.load %arg5[%c0_5, %c0_6] : memref<256x256xbf16, #tpu.memory_space<vmem>>, vector<256x256xbf16>
    %cst_7 = arith.constant dense<0.000000e+00> : vector<256x256xf32>
    %7 = tpu.matmul %5, %6, %cst_7 {dimension_numbers = #tpu.dot_dimension_numbers<[1], [0], [0], [1], [0, 0, 1, 1], [], []>} : vector<256x256xbf16>, vector<256x256xbf16>, vector<256x256xf32> -> vector<256x256xf32>
    %c0_i32 = arith.constant 0 : i32
    %8 = arith.cmpi eq, %arg2, %c0_i32 : i32
    %9 = arith.extui %8 : i1 to i32
    %c0_i32_8 = arith.constant 0 : i32
    %10 = arith.cmpi ne, %9, %c0_i32_8 : i32
    scf.if %10 {
      %c0_13 = arith.constant 0 : index
      %c0_14 = arith.constant 0 : index
      %17 = vector.load %arg9[%c0_13, %c0_14] : memref<256x256xf32, #tpu.memory_space<vmem>>, vector<256x256xf32>
      tpu.vector_store %arg9[%c0_13, %c0_14], %7 {strides = array<i32>} : memref<256x256xf32, #tpu.memory_space<vmem>>, vector<256x256xf32>,
    } else {
    }
    %c0_i32_9 = arith.constant 0 : i32
    %11 = arith.cmpi sgt, %arg2, %c0_i32_9 : i32
    %12 = arith.extui %11 : i1 to i32
    %c0_i32_10 = arith.constant 0 : i32
    %13 = arith.cmpi ne, %12, %c0_i32_10 : i32
    scf.if %13 {
      %c0_13 = arith.constant 0 : index
      %c0_14 = arith.constant 0 : index
      %17 = vector.load %arg9[%c0_13, %c0_14] : memref<256x256xf32, #tpu.memory_space<vmem>>, vector<256x256xf32>
      %18 = arith.addf %17, %7 : vector<256x256xf32>
      %c0_15 = arith.constant 0 : index
      %c0_16 = arith.constant 0 : index
      %19 = vector.load %arg9[%c0_15, %c0_16] : memref<256x256xf32, #tpu.memory_space<vmem>>, vector<256x256xf32>
      tpu.vector_store %arg9[%c0_15, %c0_16], %18 {strides = array<i32>} : memref<256x256xf32, #tpu.memory_space<vmem>>, vector<256x256xf32>,
    } else {
    }
    %c0_i32_11 = arith.constant 0 : i32
    %14 = arith.cmpi eq, %arg2, %c0_i32_11 : i32
    %15 = arith.extui %14 : i1 to i32
    %c0_i32_12 = arith.constant 0 : i32
    %16 = arith.cmpi ne, %15, %c0_i32_12 : i32
    scf.if %16 {
      %c0_13 = arith.constant 0 : index
      %c0_14 = arith.constant 0 : index
      %17 = vector.load %arg9[%c0_13, %c0_14] : memref<256x256xf32, #tpu.memory_space<vmem>>, vector<256x256xf32>
      %c0_15 = arith.constant 0 : index
      %c0_16 = arith.constant 0 : index
      %18 = vector.load %arg6[%c0_15, %c0_16] : memref<1x256xf32, #tpu.memory_space<vmem>>, vector<1x256xf32>
      %19 = vector.broadcast %18 : vector<1x256xf32> to vector<256x256xf32>
      %20 = arith.addf %17, %19 : vector<256x256xf32>
      %cst_17 = arith.constant dense<0xFF800000> : vector<256xf32>
      %21 = vector.multi_reduction <maximumf>, %20, %cst_17 [1] : vector<256x256xf32> to vector<256xf32>
      %22 = vector.shape_cast %21 : vector<256xf32> to vector<256x1xf32>
      %23 = vector.broadcast %22 : vector<256x1xf32> to vector<256x256xf32>
      %24 = arith.subf %20, %23 : vector<256x256xf32>
      %25 = math.exp %24 : vector<256x256xf32>
      %cst_18 = arith.constant dense<0.000000e+00> : vector<256xf32>
      %26 = vector.multi_reduction <add>, %25, %cst_18 [1] : vector<256x256xf32> to vector<256xf32>
      %27 = vector.shape_cast %26 : vector<256xf32> to vector<256x1xf32>
      %28 = tpu.reciprocal %27 {approx = true} : vector<256x1xf32> -> vector<256x1xf32>
      %29 = vector.broadcast %28 : vector<256x1xf32> to vector<256x256xf32>
      %30 = arith.mulf %25, %29 : vector<256x256xf32>
      %31 = arith.truncf %30 : vector<256x256xf32> to vector<256x256xbf16>
      %c0_19 = arith.constant 0 : index
      %c0_20 = arith.constant 0 : index
      %c0_21 = arith.constant 0 : index
      %32 = vector.load %arg7[%c0_19, %c0_20, %c0_21] : memref<1x256x4xbf16, #tpu.memory_space<vmem>>, vector<1x256x4xbf16>
      %33 = vector.shape_cast %32 : vector<1x256x4xbf16> to vector<256x4xbf16>
      %cst_22 = arith.constant dense<0.000000e+00> : vector<256x4xf32>
      %34 = tpu.matmul %31, %33, %cst_22 {dimension_numbers = #tpu.dot_dimension_numbers<[1], [0], [0], [1], [0, 0, 1, 1], [], []>} : vector<256x256xbf16>, vector<256x4xbf16>, vector<256x4xf32> -> vector<256x4xf32>
      %c0_23 = arith.constant 0 : index
      %c0_24 = arith.constant 0 : index
      %c0_25 = arith.constant 0 : index
      %35 = vector.load %arg8[%c0_23, %c0_24, %c0_25] : memref<1x256x4xf32, #tpu.memory_space<vmem>>, vector<1x256x4xf32>
      %36 = vector.shape_cast %35 : vector<1x256x4xf32> to vector<256x4xf32>
      %37 = vector.shape_cast %34 : vector<256x4xf32> to vector<1x256x4xf32>
      tpu.vector_store %arg8[%c0_23, %c0_24, %c0_25], %37 {strides = array<i32>} : memref<1x256x4xf32, #tpu.memory_space<vmem>>, vector<1x256x4xf32>,
    } else {
    }
    return
  }
  func.func @transform_0(%arg0: i32, %arg1: i32, %arg2: i32) -> (i32, i32, i32) {
    %c0_i32 = arith.constant 0 : i32
    %c0_i32_0 = arith.constant 0 : i32
    return %arg0, %arg1, %c0_i32 : i32, i32, i32
  }
  func.func @transform_1(%arg0: i32, %arg1: i32, %arg2: i32) -> (i32, i32, i32) {
    %c0_i32 = arith.constant 0 : i32
    %c0_i32_0 = arith.constant 0 : i32
    return %arg0, %c0_i32, %arg2 : i32, i32, i32
  }
  func.func @transform_2(%arg0: i32, %arg1: i32, %arg2: i32) -> (i32, i32) {
    %c0_i32 = arith.constant 0 : i32
    %c0_i32_0 = arith.constant 0 : i32
    return %arg2, %c0_i32 : i32, i32
  }
  func.func @transform_3(%arg0: i32, %arg1: i32, %arg2: i32) -> (i32, i32) {
    %c0_i32 = arith.constant 0 : i32
    %c0_i32_0 = arith.constant 0 : i32
    %c0_i32_1 = arith.constant 0 : i32
    return %c0_i32, %c0_i32_0 : i32, i32
  }
  func.func @transform_4(%arg0: i32, %arg1: i32, %arg2: i32) -> (i32, i32, i32) {
    %c0_i32 = arith.constant 0 : i32
    %c0_i32_0 = arith.constant 0 : i32
    %c0_i32_1 = arith.constant 0 : i32
    return %arg0, %c0_i32, %c0_i32_0 : i32, i32, i32
  }
  func.func @transform_5(%arg0: i32, %arg1: i32, %arg2: i32) -> (i32, i32, i32) {
    %c0_i32 = arith.constant 0 : i32
    %c0_i32_0 = arith.constant 0 : i32
    return %arg0, %arg1, %c0_i32 : i32, i32, i32
  }
}

</mosaic_0001>

<bundles_post_ra>
// kernel: tpu_custom_call.1
= control target key start
LH: loop header
LB: loop body
LE: loop exit
PB: predicated region body
PF: predicated region fallthrough
CT: control target
= control target key end

     0   :  { %s3140_s18 = smov 0   ;;  %s3142_s19 = smov 0   ;;  %s4118_s0 = inlined_call_operand.vmem [shape: bf16[2,256,64], index: 0, kind: input, shape index: {}]   ;;  %s4119_s1 = inlined_call_operand.vmem [shape: bf16[2,64,256], index: 1, kind: input, shape index: {}]   ;;  %s4120_s2 = inlined_call_operand.vmem [shape: bf16[256,256], index: 2, kind: input, shape index: {}]   ;;  %s4121_s3 = inlined_call_operand.vmem [shape: f32[1,256], index: 3, kind: input, shape index: {}]   ;;  %s4122_s4 = inlined_call_operand.vmem [shape: bf16[2,256,4], index: 4, kind: input, shape index: {}]   ;;  %s4123_s5 = inlined_call_operand.vmem [shape: f32[2,256,4], index: 5, kind: output, shape index: {}]  }
   0x1   :  { %s3144_s20 = smov 0  }
   0x2 LB: > { %s34_s21 = sadd.s32 1, %s3103_s19  ;;  %p2553_p0 = scmp.ge.s32.totalorder %s3107_s20, 1  ;;  %s3107_s20 = sphi %s3144_s20, %s15_s20   ;;  %s3103_s19 = sphi %s3142_s19, %s4215_s19   ;;  %s3099_s18 = sphi %s3140_s18, %s4214_s18  }
   0x3   : > { %p36_p1 = scmp.ge.s32.totalorder %s34_s21, 2  ;;  %p254_p2 = scmp.lt.s32.totalorder %s3107_s20, 3 }
   0x5   : > { %s4217_s21 = smov (%p36_p1, %s34_s21), 0  ;;  %p255_p3 = pnand %p2553_p0, %p254_p2 }
   0x7   : > { %258 = sbr.rel (%p255_p3) target bundleno = 1199 (0x4af), region = 40 }
   0xe   : > { %p311_p4 = scmp.lt.s32.totalorder %s3099_s18, 1  ;;  %v3109_v0 = vmov 0   ;;  %v2827_v9 = vld [vmem:[%s4120_s2 + $0x4] ss:$8 sps:$4 sm:$0xff]   ;;  %vm513_vm0 = vcmask 523264   ;;  %vm2380_vm1 = vcmask 31744  }
   0xf   : > { %594 = vmatprep.mubr.bf16.mxu0 %v3109_v0  ;;  %674 = vmatprep.mubr.bf16.mxu1 %v3109_v0  ;;  %v2825_v12 = vld [vmem:[%s4120_s2] ss:$8 sps:$4 sm:$0xff]   ;;  %v2830_v13 = vld [vmem:[%s4120_s2 + $0x14] ss:$8 sps:$4 sm:$0xff]   ;;  %v2828_v14 = vld [vmem:[%s4120_s2 + $0x10] ss:$8 sps:$4 sm:$0xff]  }
  0x10   : > { %s4219_s18 = smov (!%p311_p4, %s3099_s18), 1  ;;  %v2834_v15 = vld [vmem:[%s4120_s2 + $0x24] ss:$8 sps:$4 sm:$0xff]   ;;  %v2832_v18 = vld [vmem:[%s4120_s2 + $0x20] ss:$8 sps:$4 sm:$0xff]  }
  0x11   : > { %s2653_s22 = sshll.u32 %s4219_s18, 6  ;;  %s2652_s26 = sshll.u32 %s4219_s18, 7  ;;  %v2837_v19 = vld [vmem:[%s4120_s2 + $0x34] ss:$8 sps:$4 sm:$0xff]   ;;  %v2835_v20 = vld [vmem:[%s4120_s2 + $0x30] ss:$8 sps:$4 sm:$0xff]  }
  0x12   : > { %s328_s25 = scalar_lea.vmem %s4119_s1, %s2653_s22  ;;  %s3172_s29 = scalar_lea.vmem %s4118_s0, %s2652_s26  ;;  %v2841_v22 = vld [vmem:[%s4120_s2 + $0x44] ss:$8 sps:$4 sm:$0xff]   ;;  %v2839_v24 = vld [vmem:[%s4120_s2 + $0x40] ss:$8 sps:$4 sm:$0xff]   ;;  %v2844_v25 = vld [vmem:[%s4120_s2 + $0x54] ss:$8 sps:$4 sm:$0xff]  }
  0x13   : > { %v2801_v1 = vld [vmem:[%s328_s25 + $0x4] ss:$8 sps:$4 sm:$0xff]   ;;  %v2803_v2 = vld [vmem:[%s328_s25] ss:$8 sps:$4 sm:$0xff]   ;;  %v2804_v3 = vld [vmem:[%s328_s25 + $0x14] ss:$8 sps:$4 sm:$0xff]   ;;  %s3623_s15 = scalar_lea.vmem %s4122_s4, %s2652_s26 }
  0x14   : > { %562 = vmatprep.subr.bf16.mxu0 %v2801_v1  ;;  %2768 = vmatprep.subr.bf16.mxu1 %v2801_v1  ;;  %v2806_v4 = vld [vmem:[%s328_s25 + $0x10] ss:$8 sps:$4 sm:$0xff]   ;;  %v2807_v5 = vld [vmem:[%s328_s25 + $0x24] ss:$8 sps:$4 sm:$0xff]   ;;  %v2809_v6 = vld [vmem:[%s328_s25 + $0x20] ss:$8 sps:$4 sm:$0xff]  }
  0x15   : > { %563 = vmatpush1.bf16.msra.mxu0 %v2803_v2  ;;  %2772 = vmatpush1.bf16.msra.mxu1 %v2803_v2  ;;  %v2810_v7 = vld [vmem:[%s328_s25 + $0x34] ss:$8 sps:$4 sm:$0xff]   ;;  %v2812_v8 = vld [vmem:[%s328_s25 + $0x30] ss:$8 sps:$4 sm:$0xff]   ;;  %v2813_v10 = vld [vmem:[%s3172_s29] sm:$0xff]   ;;  %s2655_s26 = sshll.u32 %s4219_s18, 8 }
  0x16   : > { %564 = vmatprep.subr.bf16.mxu0 %v2804_v3  ;;  %2769 = vmatprep.subr.bf16.mxu1 %v2804_v3  ;;  %v2821_v11 = vld [vmem:[%s3172_s29 + $0x40] sm:$0xff]   ;;  %v2814_v16 = vld [vmem:[%s3172_s29 + $0x8] sm:$0xff]   ;;  %v2815_v21 = vld [vmem:[%s3172_s29 + $0x10] sm:$0xff]   ;;  %s4043_s22 = scalar_lea.vmem %s4123_s5, %s2655_s26 }
  0x17   : > { %v2822_v17 = vld [vmem:[%s3172_s29 + $0x48] sm:$0xff]   ;;  %v2823_v23 = vld [vmem:[%s3172_s29 + $0x50] sm:$0xff]   ;;  %v2816_v28 = vld [vmem:[%s3172_s29 + $0x18] sm:$0xff]  }
  0x18   : > { %v2842_v26 = vld [vmem:[%s4120_s2 + $0x50] ss:$8 sps:$4 sm:$0xff]   ;;  %v2848_v27 = vld [vmem:[%s4120_s2 + $0x64] ss:$8 sps:$4 sm:$0xff]   ;;  %v2846_v30 = vld [vmem:[%s4120_s2 + $0x60] ss:$8 sps:$4 sm:$0xff]  }
  0x19   : > { %565 = vmatpush1.bf16.msra.mxu0 %v2806_v4  ;;  %2773 = vmatpush1.bf16.msra.mxu1 %v2806_v4  ;;  %v2824_v29 = vld [vmem:[%s3172_s29 + $0x58] sm:$0xff]   ;;  %v2855_v33 = vld [vmem:[%s4120_s2 + $0x84] ss:$8 sps:$4 sm:$0xff]   ;;  %v2853_v36 = vld [vmem:[%s4120_s2 + $0x80] ss:$8 sps:$4 sm:$0xff]  }
  0x1a   : > { %566 = vmatprep.subr.bf16.mxu0 %v2807_v5  ;;  %2770 = vmatprep.subr.bf16.mxu1 %v2807_v5  ;;  %v2851_v31 = vld [vmem:[%s4120_s2 + $0x74] ss:$8 sps:$4 sm:$0xff]   ;;  %v2849_v32 = vld [vmem:[%s4120_s2 + $0x70] ss:$8 sps:$4 sm:$0xff]   ;;  %v2817_v34 = vld [vmem:[%s3172_s29 + $0x20] sm:$0xff]  }
  0x1b   : > { %v2831_v35 = vld [vmem:[%s3172_s29 + $0x60] sm:$0xff]   ;;  %v2858_v37 = vld [vmem:[%s4120_s2 + $0x94] ss:$8 sps:$4 sm:$0xff]   ;;  %v2856_v38 = vld [vmem:[%s4120_s2 + $0x90] ss:$8 sps:$4 sm:$0xff]  }
  0x1c   : > { %v2861_v39 = vld [vmem:[%s4120_s2 + $0xa4] ss:$8 sps:$4 sm:$0xff]   ;;  %v2859_v42 = vld [vmem:[%s4120_s2 + $0xa0] ss:$8 sps:$4 sm:$0xff]   ;;  %v2864_v43 = vld [vmem:[%s4120_s2 + $0xb4] ss:$8 sps:$4 sm:$0xff]  }
  0x1d   : > { %567 = vmatpush1.bf16.msra.mxu0 %v2809_v6  ;;  %2774 = vmatpush1.bf16.msra.mxu1 %v2809_v6  ;;  %v2818_v40 = vld [vmem:[%s3172_s29 + $0x28] sm:$0xff]   ;;  %v2862_v44 = vld [vmem:[%s4120_s2 + $0xb0] ss:$8 sps:$4 sm:$0xff]   ;;  %v2870_v49 = vld [vmem:[%s4120_s2 + $0xd4] ss:$8 sps:$4 sm:$0xff]  }
  0x1e   : > { %568 = vmatprep.subr.bf16.mxu0 %v2810_v7  ;;  %2771 = vmatprep.subr.bf16.mxu1 %v2810_v7  ;;  %v2838_v41 = vld [vmem:[%s3172_s29 + $0x68] sm:$0xff]   ;;  %v2819_v46 = vld [vmem:[%s3172_s29 + $0x30] sm:$0xff]   ;;  %v2820_v52 = vld [vmem:[%s3172_s29 + $0x38] sm:$0xff]  }
  0x1f   : > { %v2867_v45 = vld [vmem:[%s4120_s2 + $0xc4] ss:$8 sps:$4 sm:$0xff]   ;;  %v2845_v47 = vld [vmem:[%s3172_s29 + $0x70] sm:$0xff]   ;;  %v2865_v48 = vld [vmem:[%s4120_s2 + $0xc0] ss:$8 sps:$4 sm:$0xff]  }
  0x20   : > { %v2868_v50 = vld [vmem:[%s4120_s2 + $0xd0] ss:$8 sps:$4 sm:$0xff]   ;;  %v2873_v51 = vld [vmem:[%s4120_s2 + $0xe4] ss:$8 sps:$4 sm:$0xff]   ;;  %v2871_v54 = vld [vmem:[%s4120_s2 + $0xe0] ss:$8 sps:$4 sm:$0xff]  }
  0x21   : > { %569 = vmatpush1.bf16.msra.mxu0 %v2812_v8  ;;  %2775 = vmatpush1.bf16.msra.mxu1 %v2812_v8  ;;  %v2852_v53 = vld [vmem:[%s3172_s29 + $0x78] sm:$0xff]  }
  0x22   : > { %979 = vmatprep.subr.bf16.mxu1 %v2827_v9  ;;  %v2876_v55 = vld [vmem:[%s4120_s2 + $0xf4] ss:$8 sps:$4 sm:$0xff]   ;;  %v2874_v56 = vld [vmem:[%s4120_s2 + $0xf0] ss:$8 sps:$4 sm:$0xff]  }
  0x24   : > { %2586 = vmatmul.mubr.msk.bf16.vlgmr.msra.gmra.mrb[0].mxu0 %vm513_vm0, %v2813_v10  ;;  %2594 = vmatmul.mubr.msk.bf16.vlgmr.msra.gmra.mrb[0].mxu1 %vm513_vm0, %v2821_v11 }
  0x25   : > { %604 = vmatprep.mubr.bf16.mxu0 %v3109_v0  ;;  %684 = vmatprep.mubr.bf16.mxu1 %v3109_v0 }
  0x26   : > { %980 = vmatpush1.bf16.msra.mxu1 %v2825_v12 }
  0x27   : > { %981 = vmatprep.subr.bf16.mxu1 %v2830_v13 }
  0x2a   : > { %982 = vmatpush1.bf16.msra.mxu1 %v2828_v14 }
  0x2b   : > { %983 = vmatprep.subr.bf16.mxu1 %v2834_v15 }
  0x2c   : > { %2587 = vmatmul.mubr.msk.bf16.gmra.mrb[4].mxu0 %vm513_vm0, %v2814_v16  ;;  %2595 = vmatmul.mubr.msk.bf16.gmra.mrb[4].mxu1 %vm513_vm0, %v2822_v17 }
  0x2d   : > { %614 = vmatprep.mubr.bf16.mxu0 %v3109_v0  ;;  %694 = vmatprep.mubr.bf16.mxu1 %v3109_v0 }
  0x2e   : > { %984 = vmatpush1.bf16.msra.mxu1 %v2832_v18 }
  0x2f   : > { %985 = vmatprep.subr.bf16.mxu1 %v2837_v19 }
  0x32   : > { %986 = vmatpush1.bf16.msra.mxu1 %v2835_v20 }
  0x33   : > { %987 = vmatprep.subr.bf16.mxu1 %v2841_v22 }
  0x34   : > { %2588 = vmatmul.mubr.msk.bf16.gmra.mrb[8].mxu0 %vm513_vm0, %v2815_v21  ;;  %2596 = vmatmul.mubr.msk.bf16.gmra.mrb[8].mxu1 %vm513_vm0, %v2823_v23 }
  0x35   : > { %624 = vmatprep.mubr.bf16.mxu0 %v3109_v0  ;;  %704 = vmatprep.mubr.bf16.mxu1 %v3109_v0 }
  0x36   : > { %988 = vmatpush1.bf16.msra.mxu1 %v2839_v24 }
  0x37   : > { %989 = vmatprep.subr.bf16.mxu1 %v2844_v25 }
  0x3a   : > { %990 = vmatpush1.bf16.msra.mxu1 %v2842_v26 }
  0x3b   : > { %991 = vmatprep.subr.bf16.mxu1 %v2848_v27 }
  0x3c   : > { %2589 = vmatmul.mubr.msk.bf16.gmra.mrb[12].mxu0 %vm513_vm0, %v2816_v28  ;;  %2597 = vmatmul.mubr.msk.bf16.gmra.mrb[12].mxu1 %vm513_vm0, %v2824_v29 }
  0x3d   : > { %634 = vmatprep.mubr.bf16.mxu0 %v3109_v0  ;;  %714 = vmatprep.mubr.bf16.mxu1 %v3109_v0 }
  0x3e   : > { %992 = vmatpush1.bf16.msra.mxu1 %v2846_v30 }
  0x3f   : > { %993 = vmatprep.subr.bf16.mxu1 %v2851_v31 }
  0x42   : > { %994 = vmatpush1.bf16.msra.mxu1 %v2849_v32 }
  0x43   : > { %995 = vmatprep.subr.bf16.mxu1 %v2855_v33 }
  0x44   : > { %2590 = vmatmul.mubr.msk.bf16.gmra.mrb[16].mxu0 %vm513_vm0, %v2817_v34  ;;  %2598 = vmatmul.mubr.msk.bf16.gmra.mrb[16].mxu1 %vm513_vm0, %v2831_v35 }
  0x45   : > { %644 = vmatprep.mubr.bf16.mxu0 %v3109_v0  ;;  %724 = vmatprep.mubr.bf16.mxu1 %v3109_v0 }
  0x46   : > { %996 = vmatpush1.bf16.msra.mxu1 %v2853_v36 }
  0x47   : > { %997 = vmatprep.subr.bf16.mxu1 %v2858_v37 }
  0x4a   : > { %998 = vmatpush1.bf16.msra.mxu1 %v2856_v38 }
  0x4b   : > { %999 = vmatprep.subr.bf16.mxu1 %v2861_v39 }
  0x4c   : > { %2591 = vmatmul.mubr.msk.bf16.gmra.mrb[20].mxu0 %vm513_vm0, %v2818_v40  ;;  %2599 = vmatmul.mubr.msk.bf16.gmra.mrb[20].mxu1 %vm513_vm0, %v2838_v41 }
  0x4d   : > { %654 = vmatprep.mubr.bf16.mxu0 %v3109_v0  ;;  %734 = vmatprep.mubr.bf16.mxu1 %v3109_v0 }
  0x4e   : > { %1000 = vmatpush1.bf16.msra.mxu1 %v2859_v42 }
  0x4f   : > { %1001 = vmatprep.subr.bf16.mxu1 %v2864_v43 }
  0x52   : > { %1002 = vmatpush1.bf16.msra.mxu1 %v2862_v44 }
  0x53   : > { %1003 = vmatprep.subr.bf16.mxu1 %v2867_v45 }
  0x54   : > { %2592 = vmatmul.mubr.msk.bf16.gmra.mrb[24].mxu0 %vm513_vm0, %v2819_v46  ;;  %2600 = vmatmul.mubr.msk.bf16.gmra.mrb[24].mxu1 %vm513_vm0, %v2845_v47 }
  0x55   : > { %664 = vmatprep.mubr.bf16.mxu0 %v3109_v0  ;;  %744 = vmatprep.mubr.bf16.mxu1 %v3109_v0 }
  0x56   : > { %1004 = vmatpush1.bf16.msra.mxu1 %v2865_v48 }
  0x57   : > { %1005 = vmatprep.subr.bf16.mxu1 %v2870_v49 }
  0x5a   : > { %1006 = vmatpush1.bf16.msra.mxu1 %v2868_v50 }
  0x5b   : > { %1007 = vmatprep.subr.bf16.mxu1 %v2873_v51 }
  0x5c   : > { %2593 = vmatmul.mubr.msk.bf16.gmra.mrb[28].mxu0 %vm513_vm0, %v2820_v52  ;;  %2601 = vmatmul.mubr.msk.bf16.gmra.mrb[28].mxu1 %vm513_vm0, %v2852_v53 }
  0x5e   : > { %1008 = vmatpush1.bf16.msra.mxu1 %v2871_v54 }
  0x5f   : > { %1009 = vmatprep.subr.bf16.mxu1 %v2876_v55 }
  0x62   : > { %1010 = vmatpush1.bf16.msra.mxu1 %v2874_v56 }
  0xf7   : > { %v596_v57 = vpop.f32.mrb[0].mxu0  ;;  %v3316_v58 = vpop.f32.mrb[0].mxu1 }
  0xf8   : > { %v598_v59 = vpop.f32.mrb[1].mxu0  ;;  %v3318_v60 = vpop.f32.mrb[1].mxu1 }
  0xf9   : > { %v600_v61 = vpop.f32.mrb[2].mxu0  ;;  %v3320_v62 = vpop.f32.mrb[2].mxu1 }
  0xfa   : > { %v755_v63 = vpack.c.bf16 %v600_v61, %v596_v57  ;;  %v602_v0 = vpop.f32.mrb[3].mxu0  ;;  %v771_v1 = vpack.c.bf16 %v3320_v62, %v3316_v58  ;;  %v3324_v2 = vpop.f32.mrb[3].mxu1  ;;  %v1505_v58 = vlaneseq }
  0xfb   : > { %v756_v3 = vpack.c.bf16 %v602_v0, %v598_v59  ;;  %v772_v4 = vpack.c.bf16 %v3324_v2, %v3318_v60 }
  0xfc   : > { %v1506_v60 = vshrl.u32 %v1505_v58, 7 }
  0xfd   : > { %1011 = vmatprep.mubr.bf16.mxu1 %v756_v3 }
  0xfe   : > { %1012 = vmatmul.mubr.bf16.vlgmr.msra.gmra.mrb[32].mxu1 %v755_v63  ;;  %v1507_v62 = vsub.s32 0, %v1506_v60  ;;  %v1511_v2 = vsub.s32 1, %v1506_v60 }
  0xff   : > { %v606_v5 = vpop.f32.mrb[4].mxu0  ;;  %v3328_v6 = vpop.f32.mrb[4].mxu1 }
 0x100   : > { %v608_v7 = vpop.f32.mrb[5].mxu0  ;;  %v3330_v8 = vpop.f32.mrb[5].mxu1 }
 0x101   : > { %v610_v9 = vpop.f32.mrb[6].mxu0  ;;  %v3332_v10 = vpop.f32.mrb[6].mxu1 }
 0x102   : > { %v757_v11 = vpack.c.bf16 %v610_v9, %v606_v5  ;;  %v612_v12 = vpop.f32.mrb[7].mxu0  ;;  %v773_v13 = vpack.c.bf16 %v3332_v10, %v3328_v6  ;;  %v3336_v14 = vpop.f32.mrb[7].mxu1 }
 0x103   : > { %v758_v15 = vpack.c.bf16 %v612_v12, %v608_v7  ;;  %v774_v16 = vpack.c.bf16 %v3336_v14, %v3330_v8 }
 0x105   : > { %1021 = vmatprep.mubr.bf16.mxu1 %v758_v15 }
 0x106   : > { %1022 = vmatmul.mubr.bf16.gmra.mrb[36].mxu1 %v757_v11 }
 0x107   : > { %v616_v17 = vpop.f32.mrb[8].mxu0  ;;  %v3340_v18 = vpop.f32.mrb[8].mxu1 }
 0x108   : > { %v618_v19 = vpop.f32.mrb[9].mxu0  ;;  %v3342_v20 = vpop.f32.mrb[9].mxu1 }
 0x109   : > { %v620_v21 = vpop.f32.mrb[10].mxu0  ;;  %v3344_v22 = vpop.f32.mrb[10].mxu1 }
 0x10a   : > { %v759_v23 = vpack.c.bf16 %v620_v21, %v616_v17  ;;  %v622_v24 = vpop.f32.mrb[11].mxu0  ;;  %v775_v25 = vpack.c.bf16 %v3344_v22, %v3340_v18  ;;  %v3348_v26 = vpop.f32.mrb[11].mxu1 }
 0x10b   : > { %v760_v27 = vpack.c.bf16 %v622_v24, %v618_v19  ;;  %v776_v28 = vpack.c.bf16 %v3348_v26, %v3342_v20 }
 0x10d   : > { %1031 = vmatprep.mubr.bf16.mxu1 %v760_v27 }
 0x10e   : > { %1032 = vmatmul.mubr.bf16.gmra.mrb[40].mxu1 %v759_v23 }
 0x10f   : > { %v626_v29 = vpop.f32.mrb[12].mxu0  ;;  %v3352_v30 = vpop.f32.mrb[12].mxu1 }
 0x110   : > { %v628_v31 = vpop.f32.mrb[13].mxu0  ;;  %v3354_v32 = vpop.f32.mrb[13].mxu1 }
 0x111   : > { %v630_v33 = vpop.f32.mrb[14].mxu0  ;;  %v3356_v34 = vpop.f32.mrb[14].mxu1 }
 0x112   : > { %v761_v35 = vpack.c.bf16 %v630_v33, %v626_v29  ;;  %v632_v36 = vpop.f32.mrb[15].mxu0  ;;  %v777_v37 = vpack.c.bf16 %v3356_v34, %v3352_v30  ;;  %v3360_v38 = vpop.f32.mrb[15].mxu1 }
 0x113   : > { %v762_v39 = vpack.c.bf16 %v632_v36, %v628_v31  ;;  %v778_v40 = vpack.c.bf16 %v3360_v38, %v3354_v32 }
 0x115   : > { %1041 = vmatprep.mubr.bf16.mxu1 %v762_v39 }
 0x116   : > { %1042 = vmatmul.mubr.bf16.gmra.mrb[44].mxu1 %v761_v35 }
 0x117   : > { %v636_v41 = vpop.f32.mrb[16].mxu0  ;;  %v3364_v42 = vpop.f32.mrb[16].mxu1 }
 0x118   : > { %v638_v43 = vpop.f32.mrb[17].mxu0  ;;  %v718_v44 = vpop.f32.mrb[17].mxu1 }
 0x119   : > { %v640_v45 = vpop.f32.mrb[18].mxu0  ;;  %v720_v46 = vpop.f32.mrb[18].mxu1 }
 0x11a   : > { %v763_v47 = vpack.c.bf16 %v640_v45, %v636_v41  ;;  %v642_v48 = vpop.f32.mrb[19].mxu0  ;;  %v779_v49 = vpack.c.bf16 %v720_v46, %v3364_v42  ;;  %v722_v50 = vpop.f32.mrb[19].mxu1 }
 0x11b   : > { %v764_v51 = vpack.c.bf16 %v642_v48, %v638_v43  ;;  %v780_v52 = vpack.c.bf16 %v722_v50, %v718_v44 }
 0x11d   : > { %1051 = vmatprep.mubr.bf16.mxu1 %v764_v51 }
 0x11e   : > { %1052 = vmatmul.mubr.bf16.gmra.mrb[48].mxu1 %v763_v47 }
 0x11f   : > { %v646_v53 = vpop.f32.mrb[20].mxu0  ;;  %v726_v54 = vpop.f32.mrb[20].mxu1 }
 0x120   : > { %v648_v55 = vpop.f32.mrb[21].mxu0  ;;  %v728_v56 = vpop.f32.mrb[21].mxu1 }
 0x121   : > { %v650_v57 = vpop.f32.mrb[22].mxu0  ;;  %v730_v59 = vpop.f32.mrb[22].mxu1 }
 0x122   : > { %v765_v61 = vpack.c.bf16 %v650_v57, %v646_v53  ;;  %v652_v63 = vpop.f32.mrb[23].mxu0  ;;  %v781_v0 = vpack.c.bf16 %v730_v59, %v726_v54  ;;  %v732_v3 = vpop.f32.mrb[23].mxu1 }
 0x123   : > { %v766_v5 = vpack.c.bf16 %v652_v63, %v648_v55  ;;  %v782_v7 = vpack.c.bf16 %v732_v3, %v728_v56 }
 0x125   : > { %1061 = vmatprep.mubr.bf16.mxu1 %v766_v5 }
 0x126   : > { %1062 = vmatmul.mubr.bf16.gmra.mrb[52].mxu1 %v765_v61 }
 0x127   : > { %v656_v9 = vpop.f32.mrb[24].mxu0  ;;  %v736_v11 = vpop.f32.mrb[24].mxu1 }
 0x128   : > { %v658_v12 = vpop.f32.mrb[25].mxu0  ;;  %v738_v15 = vpop.f32.mrb[25].mxu1 }
 0x129   : > { %v660_v17 = vpop.f32.mrb[26].mxu0  ;;  %v740_v19 = vpop.f32.mrb[26].mxu1 }
 0x12a   : > { %v767_v21 = vpack.c.bf16 %v660_v17, %v656_v9  ;;  %v662_v23 = vpop.f32.mrb[27].mxu0  ;;  %v783_v24 = vpack.c.bf16 %v740_v19, %v736_v11  ;;  %v742_v27 = vpop.f32.mrb[27].mxu1 }
 0x12b   : > { %v768_v29 = vpack.c.bf16 %v662_v23, %v658_v12  ;;  %v784_v31 = vpack.c.bf16 %v742_v27, %v738_v15 }
 0x12d   : > { %1071 = vmatprep.mubr.bf16.mxu1 %v768_v29 }
 0x12e   : > { %1072 = vmatmul.mubr.bf16.gmra.mrb[56].mxu1 %v767_v21 }
 0x12f   : > { %v666_v33 = vpop.f32.mrb[28].mxu0  ;;  %v746_v35 = vpop.f32.mrb[28].mxu1 }
 0x130   : > { %v668_v36 = vpop.f32.mrb[29].mxu0  ;;  %v748_v39 = vpop.f32.mrb[29].mxu1 }
 0x131   : > { %v670_v41 = vpop.f32.mrb[30].mxu0  ;;  %v750_v42 = vpop.f32.mrb[30].mxu1 }
 0x132   : > { %v769_v43 = vpack.c.bf16 %v670_v41, %v666_v33  ;;  %v672_v44 = vpop.f32.mrb[31].mxu0  ;;  %v785_v45 = vpack.c.bf16 %v750_v42, %v746_v35  ;;  %v752_v46 = vpop.f32.mrb[31].mxu1 }
 0x133   : > { %v770_v47 = vpack.c.bf16 %v672_v44, %v668_v36  ;;  %v786_v48 = vpack.c.bf16 %v752_v46, %v748_v39 }
 0x135   : > { %1081 = vmatprep.mubr.bf16.mxu1 %v770_v47 }
 0x136   : > { %1082 = vmatmul.mubr.bf16.gmra.mrb[60].mxu1 %v769_v43 }
 0x137   : > { %1091 = vmatprep.mubr.bf16.mxu1 %v772_v4 }
 0x13e   : > { %1092 = vmatmul.mubr.bf16.gmra.mrb[64].mxu1 %v771_v1  ;;  %v1503_v1 = vld [vmem:[%s4121_s3] sm:$0x3] }
 0x13f   : > { %1101 = vmatprep.mubr.bf16.mxu1 %v774_v16  ;;  %v3394_v4 = vrot.slane %v1503_v1, %v1507_v62  ;;  %v3396_v6 = vrot.slane %v1503_v1, %v1511_v2 }
 0x146   : > { %1102 = vmatmul.mubr.bf16.gmra.mrb[68].mxu1 %v773_v13 }
 0x147   : > { %1111 = vmatprep.mubr.bf16.mxu1 %v776_v28 }
 0x14e   : > { %1112 = vmatmul.mubr.bf16.gmra.mrb[72].mxu1 %v775_v25 }
 0x14f   : > { %1121 = vmatprep.mubr.bf16.mxu1 %v778_v40 }
 0x156   : > { %1122 = vmatmul.mubr.bf16.gmra.mrb[76].mxu1 %v777_v37 }
 0x157   : > { %1131 = vmatprep.mubr.bf16.mxu1 %v780_v52 }
 0x15e   : > { %1132 = vmatmul.mubr.bf16.gmra.mrb[80].mxu1 %v779_v49 }
 0x15f   : > { %1141 = vmatprep.mubr.bf16.mxu1 %v782_v7 }
 0x166   : > { %1142 = vmatmul.mubr.bf16.gmra.mrb[84].mxu1 %v781_v0 }
 0x167   : > { %1151 = vmatprep.mubr.bf16.mxu1 %v784_v31 }
 0x16e   : > { %1152 = vmatmul.mubr.bf16.gmra.mrb[88].mxu1 %v783_v24 }
 0x16f   : > { %1161 = vmatprep.mubr.bf16.mxu1 %v786_v48 }
 0x176   : > { %1162 = vmatmul.mubr.bf16.gmra.mrb[92].mxu1 %v785_v45 }
 0x1d1   : > { %v1013_v8 = vpop.f32.mrb[32].mxu1 }
 0x1d2   : > { %v3399_v10 = vadd.f32 %v3394_v4, %v1013_v8  ;;  %v1015_v13 = vpop.f32.mrb[33].mxu1 }
 0x1d3   : > { %v3402_v14 = vadd.f32 %v3396_v6, %v1015_v13  ;;  %v1017_v16 = vpop.f32.mrb[34].mxu1 }
 0x1d4   : > { %v1019_v18 = vpop.f32.mrb[35].mxu1  ;;  %v3405_v20 = vadd.f32 %v3394_v4, %v1017_v16 }
 0x1d5   : > { %v3408_v22 = vadd.f32 %v3396_v6, %v1019_v18  ;;  %v1579_v25 = vmax.f32 %v3399_v10, %v3402_v14 }
 0x1d7   : > { %1580 = vmax.xlane.f32.xlu0 %v1579_v25  ;;  %v1582_v28 = vmax.f32 %v3405_v20, %v3408_v22 }
 0x1d9   : > { %v1023_v26 = vpop.f32.mrb[36].mxu1 }
 0x1da   : > { %v3415_v30 = vadd.f32 %v3394_v4, %v1023_v26  ;;  %v1025_v32 = vpop.f32.mrb[37].mxu1 }
 0x1db   : > { %v3418_v34 = vadd.f32 %v3396_v6, %v1025_v32  ;;  %1583 = vmax.xlane.f32.xlu0 %v1582_v28  ;;  %v1027_v37 = vpop.f32.mrb[38].mxu1 }
 0x1dc   : > { %v1029_v38 = vpop.f32.mrb[39].mxu1  ;;  %v3421_v40 = vadd.f32 %v3394_v4, %v1027_v37 }
 0x1dd   : > { %v3424_v49 = vadd.f32 %v3396_v6, %v1029_v38  ;;  %v1585_v50 = vmax.f32 %v3415_v30, %v3418_v34 }
 0x1df   : > { %1586 = vmax.xlane.f32.xlu1 %v1585_v50  ;;  %v1588_v52 = vmax.f32 %v3421_v40, %v3424_v49 }
 0x1e1   : > { %v1033_v51 = vpop.f32.mrb[40].mxu1 }
 0x1e2   : > { %v3431_v53 = vadd.f32 %v3394_v4, %v1033_v51  ;;  %v1035_v54 = vpop.f32.mrb[41].mxu1 }
 0x1e3   : > { %v3434_v55 = vadd.f32 %v3396_v6, %v1035_v54  ;;  %1589 = vmax.xlane.f32.xlu1 %v1588_v52  ;;  %v1037_v56 = vpop.f32.mrb[42].mxu1 }
 0x1e4   : > { %v3437_v57 = vadd.f32 %v3394_v4, %v1037_v56  ;;  %v1039_v59 = vpop.f32.mrb[43].mxu1 }
 0x1e5   : > { %v3440_v61 = vadd.f32 %v3396_v6, %v1039_v59  ;;  %v1591_v63 = vmax.f32 %v3431_v53, %v3434_v55 }
 0x1e7   : > { %1592 = vmax.xlane.f32.xlu0 %v1591_v63  ;;  %v1594_v0 = vmax.f32 %v3437_v57, %v3440_v61 }
 0x1e9   : > { %1595 = vmax.xlane.f32.xlu1 %v1594_v0  ;;  %v1043_v3 = vpop.f32.mrb[44].mxu1 }
 0x1ea   : > { %v3447_v5 = vadd.f32 %v3394_v4, %v1043_v3  ;;  %v1045_v7 = vpop.f32.mrb[45].mxu1 }
 0x1eb   : > { %v3450_v9 = vadd.f32 %v3396_v6, %v1045_v7  ;;  %v1047_v11 = vpop.f32.mrb[46].mxu1 }
 0x1ec   : > { %v3453_v12 = vadd.f32 %v3394_v4, %v1047_v11  ;;  %v1049_v15 = vpop.f32.mrb[47].mxu1 }
 0x1ed   : > { %v3456_v17 = vadd.f32 %v3396_v6, %v1049_v15  ;;  %v1597_v19 = vmax.f32 %v3447_v5, %v3450_v9 }
 0x1ef   : > { %1598 = vmax.xlane.f32.xlu0 %v1597_v19  ;;  %v1600_v21 = vmax.f32 %v3453_v12, %v3456_v17 }
 0x1f1   : > { %1601 = vmax.xlane.f32.xlu1 %v1600_v21  ;;  %v1053_v23 = vpop.f32.mrb[48].mxu1 }
 0x1f2   : > { %v3463_v24 = vadd.f32 %v3394_v4, %v1053_v23  ;;  %v1055_v27 = vpop.f32.mrb[49].mxu1 }
 0x1f3   : > { %v3466_v29 = vadd.f32 %v3396_v6, %v1055_v27  ;;  %v1057_v31 = vpop.f32.mrb[50].mxu1 }
 0x1f4   : > { %v3469_v33 = vadd.f32 %v3394_v4, %v1057_v31  ;;  %v1059_v35 = vpop.f32.mrb[51].mxu1 }
 0x1f5   : > { %v3472_v36 = vadd.f32 %v3396_v6, %v1059_v35  ;;  %v1603_v39 = vmax.f32 %v3463_v24, %v3466_v29 }
 0x1f7   : > { %1604 = vmax.xlane.f32.xlu0 %v1603_v39  ;;  %v1606_v41 = vmax.f32 %v3469_v33, %v3472_v36 }
 0x1f9   : > { %1607 = vmax.xlane.f32.xlu1 %v1606_v41  ;;  %v1063_v42 = vpop.f32.mrb[52].mxu1 }
 0x1fa   : > { %v3479_v43 = vadd.f32 %v3394_v4, %v1063_v42  ;;  %v1065_v44 = vpop.f32.mrb[53].mxu1 }
 0x1fb   : > { %v3482_v45 = vadd.f32 %v3396_v6, %v1065_v44  ;;  %v1067_v46 = vpop.f32.mrb[54].mxu1 }
 0x1fc   : > { %v3485_v47 = vadd.f32 %v3394_v4, %v1067_v46  ;;  %v1069_v48 = vpop.f32.mrb[55].mxu1 }
 0x1fd   : > { %v3488_v58 = vadd.f32 %v3396_v6, %v1069_v48  ;;  %v1609_v60 = vmax.f32 %v3479_v43, %v3482_v45 }
 0x1ff   : > { %1610 = vmax.xlane.f32.xlu0 %v1609_v60  ;;  %v1612_v62 = vmax.f32 %v3485_v47, %v3488_v58 }
 0x201   : > { %1613 = vmax.xlane.f32.xlu1 %v1612_v62  ;;  %v1073_v1 = vpop.f32.mrb[56].mxu1 }
 0x202   : > { %v3495_v2 = vadd.f32 %v3394_v4, %v1073_v1  ;;  %v1075_v8 = vpop.f32.mrb[57].mxu1 }
 0x203   : > { %v3498_v13 = vadd.f32 %v3396_v6, %v1075_v8  ;;  %v1077_v16 = vpop.f32.mrb[58].mxu1 }
 0x204   : > { %v3501_v18 = vadd.f32 %v3394_v4, %v1077_v16  ;;  %v1079_v25 = vpop.f32.mrb[59].mxu1 }
 0x205   : > { %v3504_v26 = vadd.f32 %v3396_v6, %v1079_v25  ;;  %v1615_v28 = vmax.f32 %v3495_v2, %v3498_v13 }
 0x207   : > { %1616 = vmax.xlane.f32.xlu0 %v1615_v28  ;;  %v1618_v32 = vmax.f32 %v3501_v18, %v3504_v26 }
 0x209   : > { %1619 = vmax.xlane.f32.xlu1 %v1618_v32  ;;  %v1083_v37 = vpop.f32.mrb[60].mxu1 }
 0x20a   : > { %v3511_v38 = vadd.f32 %v3394_v4, %v1083_v37  ;;  %v1085_v50 = vpop.f32.mrb[61].mxu1 }
 0x20b   : > { %v3514_v51 = vadd.f32 %v3396_v6, %v1085_v50  ;;  %v1087_v52 = vpop.f32.mrb[62].mxu1 }
 0x20c   : > { %v3517_v54 = vadd.f32 %v3394_v4, %v1087_v52  ;;  %v1089_v56 = vpop.f32.mrb[63].mxu1 }
 0x20d   : > { %v3520_v59 = vadd.f32 %v3396_v6, %v1089_v56  ;;  %v1621_v63 = vmax.f32 %v3511_v38, %v3514_v51 }
 0x20f   : > { %1622 = vmax.xlane.f32.xlu0 %v1621_v63  ;;  %v1624_v0 = vmax.f32 %v3517_v54, %v3520_v59 }
 0x211   : > { %1625 = vmax.xlane.f32.xlu1 %v1624_v0  ;;  %v1093_v3 = vpop.f32.mrb[64].mxu1 }
 0x212   : > { %v3527_v7 = vadd.f32 %v3394_v4, %v1093_v3  ;;  %v1095_v11 = vpop.f32.mrb[65].mxu1 }
 0x213   : > { %v3530_v15 = vadd.f32 %v3396_v6, %v1095_v11  ;;  %v1097_v19 = vpop.f32.mrb[66].mxu1 }
 0x214   : > { %4154 = vst [vmem:[#allocation3_spill] sm:$0xff] %v3527_v7  ;;  %v3533_v21 = vadd.f32 %v3394_v4, %v1097_v19  ;;  %v1099_v23 = vpop.f32.mrb[67].mxu1 }
 0x215   : > { %4155 = vst [vmem:[#allocation4_spill] sm:$0xff] %v3530_v15  ;;  %v3536_v27 = vadd.f32 %v3396_v6, %v1099_v23  ;;  %v1627_v31 = vmax.f32 %v3527_v7, %v3530_v15 }
 0x216   : > { %4156 = vst [vmem:[#allocation5_spill] sm:$0xff] %v3533_v21 }
 0x217   : > { %4157 = vst [vmem:[#allocation6_spill] sm:$0xff] %v3536_v27  ;;  %1628 = vmax.xlane.f32.xlu0 %v1627_v31  ;;  %v1630_v35 = vmax.f32 %v3533_v21, %v3536_v27 }
 0x219   : > { %1631 = vmax.xlane.f32.xlu1 %v1630_v35  ;;  %v1103_v39 = vpop.f32.mrb[68].mxu1 }
 0x21a   : > { %v3543_v41 = vadd.f32 %v3394_v4, %v1103_v39  ;;  %v1105_v42 = vpop.f32.mrb[69].mxu1 }
 0x21b   : > { %v3546_v44 = vadd.f32 %v3396_v6, %v1105_v42  ;;  %v1107_v46 = vpop.f32.mrb[70].mxu1 }
 0x21c   : > { %4158 = vst [vmem:[#allocation7_spill] sm:$0xff] %v3543_v41  ;;  %v3549_v48 = vadd.f32 %v3394_v4, %v1107_v46  ;;  %v1109_v60 = vpop.f32.mrb[71].mxu1 }
 0x21d   : > { %4159 = vst [vmem:[#allocation8_spill] sm:$0xff] %v3546_v44  ;;  %v3552_v62 = vadd.f32 %v3396_v6, %v1109_v60  ;;  %v1633_v1 = vmax.f32 %v3543_v41, %v3546_v44 }
 0x21e   : > { %4160 = vst [vmem:[#allocation9_spill] sm:$0xff] %v3549_v48 }
 0x21f   : > { %4161 = vst [vmem:[#allocation10_spill] sm:$0xff] %v3552_v62  ;;  %1634 = vmax.xlane.f32.xlu0 %v1633_v1  ;;  %v1636_v8 = vmax.f32 %v3549_v48, %v3552_v62 }
 0x221   : > { %1637 = vmax.xlane.f32.xlu1 %v1636_v8  ;;  %v1113_v16 = vpop.f32.mrb[72].mxu1 }
 0x222   : > { %v3559_v25 = vadd.f32 %v3394_v4, %v1113_v16  ;;  %v1115_v28 = vpop.f32.mrb[73].mxu1 }
 0x223   : > { %v3562_v32 = vadd.f32 %v3396_v6, %v1115_v28  ;;  %v1117_v37 = vpop.f32.mrb[74].mxu1 }
 0x224   : > { %4162 = vst [vmem:[#allocation11_spill] sm:$0xff] %v3559_v25  ;;  %v3565_v50 = vadd.f32 %v3394_v4, %v1117_v37  ;;  %v1119_v52 = vpop.f32.mrb[75].mxu1 }
 0x225   : > { %4163 = vst [vmem:[#allocation12_spill] sm:$0xff] %v3562_v32  ;;  %v3568_v56 = vadd.f32 %v3396_v6, %v1119_v52  ;;  %v1639_v63 = vmax.f32 %v3559_v25, %v3562_v32  ;;  %v2881_v32 = vld [vmem:[%s3623_s15 + $0x50] sm:$0xff]  }
 0x226   : > { %4164 = vst [vmem:[#allocation13_spill] sm:$0xff] %v3565_v50  ;;  %v2882_v25 = vld [vmem:[%s3623_s15 + $0x10] sm:$0xff]  }
 0x227   : > { %4165 = vst [vmem:[#allocation14_spill] sm:$0xff] %v3568_v56  ;;  %1640 = vmax.xlane.f32.xlu0 %v1639_v63  ;;  %v1642_v0 = vmax.f32 %v3565_v50, %v3568_v56  ;;  %v2879_v56 = vld [vmem:[%s3623_s15 + $0x48] sm:$0xff]  }
 0x228   : > { %v2880_v50 = vld [vmem:[%s3623_s15 + $0x8] sm:$0xff]  }
 0x229   : > { %1643 = vmax.xlane.f32.xlu1 %v1642_v0  ;;  %v1123_v3 = vpop.f32.mrb[76].mxu1 }
 0x22a   : > { %v3575_v11 = vadd.f32 %v3394_v4, %v1123_v3  ;;  %v1125_v19 = vpop.f32.mrb[77].mxu1 }
 0x22b   : > { %v3578_v23 = vadd.f32 %v3396_v6, %v1125_v19  ;;  %v1127_v31 = vpop.f32.mrb[78].mxu1 }
 0x22c   : > { %4166 = vst [vmem:[#allocation15_spill] sm:$0xff] %v3575_v11  ;;  %v3581_v35 = vadd.f32 %v3394_v4, %v1127_v31  ;;  %v1129_v39 = vpop.f32.mrb[79].mxu1 }
 0x22d   : > { %4167 = vst [vmem:[#allocation16_spill] sm:$0xff] %v3578_v23  ;;  %v3584_v42 = vadd.f32 %v3396_v6, %v1129_v39  ;;  %v1645_v46 = vmax.f32 %v3575_v11, %v3578_v23  ;;  %v2877_v23 = vld [vmem:[%s3623_s15 + $0x40] sm:$0xff]  }
 0x22e   : > { %4168 = vst [vmem:[#allocation17_spill] sm:$0xff] %v3581_v35  ;;  %v2878_v11 = vld [vmem:[%s3623_s15] sm:$0xff]   ;;  %2656 = vmatprep.subr.bf16.mxu0 %v2877_v23 }
 0x22f   : > { %4169 = vst [vmem:[#allocation18_spill] sm:$0xff] %v3584_v42  ;;  %1646 = vmax.xlane.f32.xlu0 %v1645_v46  ;;  %v1648_v60 = vmax.f32 %v3581_v35, %v3584_v42  ;;  %2657 = vmatpush3.bf16.msra.mxu0 %v2878_v11 }
 0x230   : > { %2658 = vmatprep.subr.bf16.mxu0 %v2879_v56 }
 0x231   : > { %1649 = vmax.xlane.f32.xlu1 %v1648_v60  ;;  %v1133_v1 = vpop.f32.mrb[80].mxu1 }
 0x232   : > { %v1135_v8 = vpop.f32.mrb[81].mxu1 }
 0x233   : > { %v3590_v16 = vpop.f32.mrb[82].mxu1  ;;  %2659 = vmatpush3.bf16.msra.mxu0 %v2880_v50 }
 0x234   : > { %v3592_v28 = vpop.f32.mrb[83].mxu1  ;;  %2660 = vmatprep.subr.bf16.mxu0 %v2881_v32 }
 0x237   : > { %2661 = vmatpush3.bf16.msra.mxu0 %v2882_v25 }
 0x239   : > { %v3594_v37 = vpop.f32.mrb[84].mxu1 }
 0x23a   : > { %v3596_v52 = vpop.f32.mrb[85].mxu1 }
 0x23b   : > { %v3598_v63 = vpop.f32.mrb[86].mxu1 }
 0x23c   : > { %v3600_v0 = vpop.f32.mrb[87].mxu1 }
 0x241   : > { %v3602_v3 = vpop.f32.mrb[88].mxu1 }
 0x242   : > { %v3604_v19 = vpop.f32.mrb[89].mxu1 }
 0x243   : > { %v3606_v31 = vpop.f32.mrb[90].mxu1 }
 0x244   : > { %v3608_v39 = vpop.f32.mrb[91].mxu1 }
 0x249   : > { %v3610_v46 = vpop.f32.mrb[92].mxu1 }
 0x24a   : > { %v3612_v60 = vpop.f32.mrb[93].mxu1 }
 0x24b   : > { %v3614_v42 = vpop.f32.mrb[94].mxu1 }
 0x24c   : > { %v3616_v35 = vpop.f32.mrb[95].mxu1 }
 0x264   : > { %v1581_v62 = vpop.xlane.xlu0 %1580 }
 0x265   : > { %v1675_v48 = vsub.f32 %v3399_v10, %v1581_v62  ;;  %v1676_v44 = vsub.f32 %v3402_v14, %v1581_v62 }
 0x267   : > { %v1739_v41 = vmul.f32 1.442695, %v1675_v48  ;;  %v1741_v27 = vmul.f32 1.442695, %v1676_v44 }
 0x268   : > { %v1584_v21 = vpop.xlane.xlu0 %1583 }
 0x269   : > { %2893 = vpow2.f32 %v1739_v41  ;;  %v1677_v23 = vsub.f32 %v3405_v20, %v1584_v21  ;;  %v1678_v11 = vsub.f32 %v3408_v22, %v1584_v21 }
 0x26a   : > { %2895 = vpow2.f32 %v1741_v27 }
 0x26b   : > { %v1743_v56 = vmul.f32 1.442695, %v1677_v23  ;;  %v1745_v15 = vmul.f32 1.442695, %v1678_v11 }
 0x26c   : > { %v1587_v7 = vpop.xlane.xlu1 %1586 }
 0x26d   : > { %2897 = vpow2.f32 %v1743_v56  ;;  %v1679_v25 = vsub.f32 %v3415_v30, %v1587_v7  ;;  %v1680_v32 = vsub.f32 %v3418_v34, %v1587_v7  ;;  %v3644_v30 = vadd.f32 %v3394_v4, %v1133_v1 }
 0x26e   : > { %2899 = vpow2.f32 %v1745_v15  ;;  %v3647_v34 = vadd.f32 %v3396_v6, %v1135_v8 }
 0x26f   : > { %v1747_v10 = vmul.f32 1.442695, %v1679_v25  ;;  %v1749_v14 = vmul.f32 1.442695, %v1680_v32 }
 0x270   : > { %v1590_v48 = vpop.xlane.xlu1 %1589  ;;  %v1651_v25 = vmax.f32 %v3644_v30, %v3647_v34 }
 0x271   : > { %2901 = vpow2.f32 %v1747_v10  ;;  %v1681_v41 = vsub.f32 %v3421_v40, %v1590_v48  ;;  %v1682_v20 = vsub.f32 %v3424_v49, %v1590_v48 }
 0x272   : > { %2903 = vpow2.f32 %v1749_v14  ;;  %v3681_v14 = vadd.f32 %v3396_v6, %v3596_v52 }
 0x273   : > { %v3639_v22 = vpop.eup %2893  ;;  %v1751_v21 = vmul.f32 1.442695, %v1681_v41  ;;  %v1753_v27 = vmul.f32 1.442695, %v1682_v20 }
 0x274   : > { %v3641_v44 = vpop.eup %2895  ;;  %v1593_v7 = vpop.xlane.xlu0 %1592 }
 0x275   : > { %2905 = vpow2.f32 %v1751_v21  ;;  %v1683_v15 = vsub.f32 %v3431_v53, %v1593_v7  ;;  %v1684_v40 = vsub.f32 %v3434_v55, %v1593_v7  ;;  %v1867_v49 = vadd.f32 %v3641_v44, %v3639_v22 }
 0x276   : > { %2907 = vpow2.f32 %v1753_v27  ;;  %v1596_v62 = vpop.xlane.xlu1 %1595  ;;  %v3661_v53 = vadd.f32 %v3394_v4, %v3590_v16  ;;  %v3665_v55 = vadd.f32 %v3396_v6, %v3592_v28  ;;  %v3677_v28 = vadd.f32 %v3394_v4, %v3594_v37 }
 0x277   : > { %v3653_v50 = vpop.eup %2897  ;;  %v1755_v23 = vmul.f32 1.442695, %v1683_v15  ;;  %v1757_v11 = vmul.f32 1.442695, %v1684_v40  ;;  %v1685_v1 = vsub.f32 %v3437_v57, %v1596_v62  ;;  %v1686_v8 = vsub.f32 %v3440_v61, %v1596_v62  ;;  %1868 = vadd.xlane.f32.xlu0 %v1867_v49 }
 0x278   : > { %v3657_v56 = vpop.eup %2899  ;;  %v1654_v27 = vmax.f32 %v3661_v53, %v3665_v55  ;;  %v3701_v62 = vadd.f32 %v3396_v6, %v3600_v0  ;;  %v3713_v0 = vadd.f32 %v3394_v4, %v3602_v3 }
 0x279   : > { %2909 = vpow2.f32 %v1755_v23  ;;  %v1759_v32 = vmul.f32 1.442695, %v1685_v1  ;;  %v1761_v10 = vmul.f32 1.442695, %v1686_v8  ;;  %v1870_v57 = vadd.f32 %v3657_v56, %v3653_v50 }
 0x27a   : > { %2911 = vpow2.f32 %v1757_v11  ;;  %v1657_v23 = vmax.f32 %v3677_v28, %v3681_v14  ;;  %v3717_v8 = vadd.f32 %v3396_v6, %v3604_v19 }
 0x27b   : > { %v3671_v61 = vpop.eup %2901  ;;  %2913 = vpow2.f32 %v1759_v32  ;;  %1871 = vadd.xlane.f32.xlu1 %v1870_v57  ;;  %1652 = vmax.xlane.f32.xlu0 %v1651_v25  ;;  %v2883_v32 = vld [vmem:[%s3623_s15 + $0x58] sm:$0xff]  }
 0x27c   : > { %v3673_v16 = vpop.eup %2903  ;;  %2915 = vpow2.f32 %v1761_v10  ;;  %v1599_v48 = vpop.xlane.xlu0 %1598  ;;  %2662 = vmatprep.subr.bf16.mxu0 %v2883_v32 }
 0x27d   : > { %v1687_v41 = vsub.f32 %v3447_v5, %v1599_v48  ;;  %v1688_v20 = vsub.f32 %v3450_v9, %v1599_v48  ;;  %v1873_v21 = vadd.f32 %v3673_v16, %v3671_v61  ;;  %v3697_v9 = vadd.f32 %v3394_v4, %v3598_v63 }
 0x27e   : > { %v1602_v7 = vpop.xlane.xlu1 %1601 }
 0x27f   : > { %v3689_v15 = vpop.eup %2905  ;;  %v1763_v37 = vmul.f32 1.442695, %v1687_v41  ;;  %v1765_v40 = vmul.f32 1.442695, %v1688_v20  ;;  %v1689_v49 = vsub.f32 %v3453_v12, %v1602_v7  ;;  %v1690_v52 = vsub.f32 %v3456_v17, %v1602_v7  ;;  %1874 = vadd.xlane.f32.xlu0 %v1873_v21  ;;  %1655 = vmax.xlane.f32.xlu1 %v1654_v27  ;;  %v2884_v20 = vld [vmem:[%s3623_s15 + $0x18] sm:$0xff]  }
 0x280   : > { %v3693_v5 = vpop.eup %2907  ;;  %v1660_v3 = vmax.f32 %v3697_v9, %v3701_v62  ;;  %2663 = vmatpush3.bf16.msra.mxu0 %v2884_v20 }
 0x281   : > { %2917 = vpow2.f32 %v1763_v37  ;;  %v1767_v12 = vmul.f32 1.442695, %v1689_v49  ;;  %v1769_v11 = vmul.f32 1.442695, %v1690_v52  ;;  %v1876_v17 = vadd.f32 %v3693_v5, %v3689_v15  ;;  %v2885_v52 = vld [vmem:[%s3623_s15 + $0x60] sm:$0xff]  }
 0x282   : > { %2919 = vpow2.f32 %v1765_v40  ;;  %v3739_v40 = vadd.f32 %v3396_v6, %v3608_v39  ;;  %v1663_v49 = vmax.f32 %v3713_v0, %v3717_v8  ;;  %2664 = vmatprep.subr.bf16.mxu0 %v2885_v52 }
 0x283   : > { %v3707_v1 = vpop.eup %2909  ;;  %2921 = vpow2.f32 %v1767_v12  ;;  %1877 = vadd.xlane.f32.xlu1 %v1876_v17  ;;  %1658 = vmax.xlane.f32.xlu0 %v1657_v23  ;;  %v2886_v12 = vld [vmem:[%s3623_s15 + $0x20] sm:$0xff]   ;;  %v3757_v17 = vadd.f32 %v3396_v6, %v3612_v60  ;;  %v2888_v60 = vld [vmem:[%s3623_s15 + $0x28] sm:$0xff]  }
 0x284   : > { %v3709_v63 = vpop.eup %2911  ;;  %2923 = vpow2.f32 %v1769_v11  ;;  %v1605_v25 = vpop.xlane.xlu0 %1604  ;;  %v3753_v11 = vadd.f32 %v3394_v4, %v3610_v46  ;;  %2665 = vmatpush3.bf16.msra.mxu0 %v2886_v12  ;;  %v2887_v46 = vld [vmem:[%s3623_s15 + $0x68] sm:$0xff]  }
 0x285   : > { %v3720_v10 = vpop.eup %2913  ;;  %v1691_v57 = vsub.f32 %v3463_v24, %v1605_v25  ;;  %v1692_v48 = vsub.f32 %v3466_v29, %v1605_v25  ;;  %v1879_v41 = vadd.f32 %v3709_v63, %v3707_v1  ;;  %v3735_v29 = vadd.f32 %v3394_v4, %v3606_v31  ;;  %2666 = vmatprep.subr.bf16.mxu0 %v2887_v46  ;;  %v2892_v46 = vld [vmem:[%s3623_s15 + $0x38] sm:$0xff]  }
 0x286   : > { %v3729_v21 = vpop.eup %2915  ;;  %v1608_v19 = vpop.xlane.xlu1 %1607 }
 0x287   : > { %v1771_v27 = vmul.f32 1.442695, %v1691_v57  ;;  %v1773_v7 = vmul.f32 1.442695, %v1692_v48  ;;  %v1693_v37 = vsub.f32 %v3469_v33, %v1608_v19  ;;  %v1694_v24 = vsub.f32 %v3472_v36, %v1608_v19  ;;  %1880 = vadd.xlane.f32.xlu0 %v1879_v41  ;;  %1661 = vmax.xlane.f32.xlu1 %v1660_v3 }
 0x288   : > { %v1882_v36 = vadd.f32 %v3729_v21, %v3720_v10  ;;  %v1666_v3 = vmax.f32 %v3735_v29, %v3739_v40  ;;  %2667 = vmatpush3.bf16.msra.mxu0 %v2888_v60 }
 0x289   : > { %2925 = vpow2.f32 %v1771_v27  ;;  %v1775_v23 = vmul.f32 1.442695, %v1693_v37  ;;  %v1777_v33 = vmul.f32 1.442695, %v1694_v24  ;;  %v3779_v24 = vadd.f32 %v3396_v6, %v3616_v35 }
 0x28a   : > { %2927 = vpow2.f32 %v1773_v7 }
 0x28b   : > { %v3747_v31 = vpop.eup %2917  ;;  %2929 = vpow2.f32 %v1775_v23  ;;  %1883 = vadd.xlane.f32.xlu1 %v1882_v36  ;;  %1664 = vmax.xlane.f32.xlu0 %v1663_v49  ;;  %v1669_v49 = vmax.f32 %v3753_v11, %v3757_v17 }
 0x28c   : > { %v3749_v39 = vpop.eup %2919  ;;  %2931 = vpow2.f32 %v1777_v33  ;;  %v1611_v25 = vpop.xlane.xlu0 %1610 }
 0x28d   : > { %v3759_v32 = vpop.eup %2921  ;;  %v1695_v57 = vsub.f32 %v3479_v43, %v1611_v25  ;;  %v1696_v48 = vsub.f32 %v3482_v45, %v1611_v25  ;;  %v1885_v41 = vadd.f32 %v3749_v39, %v3747_v31  ;;  %v3775_v45 = vadd.f32 %v3394_v4, %v3614_v42  ;;  %v2890_v4 = vld [vmem:[%s3623_s15 + $0x30] sm:$0xff]  }
 0x28e   : > { %v3768_v20 = vpop.eup %2923  ;;  %v1614_v19 = vpop.xlane.xlu1 %1613 }
 0x28f   : > { %v1779_v27 = vmul.f32 1.442695, %v1695_v57  ;;  %v1781_v7 = vmul.f32 1.442695, %v1696_v48  ;;  %v1697_v37 = vsub.f32 %v3485_v47, %v1614_v19  ;;  %v1698_v43 = vsub.f32 %v3488_v58, %v1614_v19  ;;  %1886 = vadd.xlane.f32.xlu0 %v1885_v41  ;;  %1667 = vmax.xlane.f32.xlu1 %v1666_v3  ;;  %v2889_v58 = vld [vmem:[%s3623_s15 + $0x70] sm:$0xff]   ;;  %v2891_v48 = vld [vmem:[%s3623_s15 + $0x78] sm:$0xff]  }
 0x290   : > { %v1888_v47 = vadd.f32 %v3768_v20, %v3759_v32  ;;  %2668 = vmatprep.subr.bf16.mxu0 %v2889_v58  ;;  %v1672_v57 = vmax.f32 %v3775_v45, %v3779_v24 }
 0x291   : > { %2933 = vpow2.f32 %v1779_v27  ;;  %v1783_v52 = vmul.f32 1.442695, %v1697_v37  ;;  %v1785_v23 = vmul.f32 1.442695, %v1698_v43  ;;  %2669 = vmatpush3.bf16.msra.mxu0 %v2890_v4 }
 0x292   : > { %2935 = vpow2.f32 %v1781_v7  ;;  %2670 = vmatprep.subr.bf16.mxu0 %v2891_v48 }
 0x293   : > { %v3787_v42 = vpop.eup %2925  ;;  %2937 = vpow2.f32 %v1783_v52  ;;  %1889 = vadd.xlane.f32.xlu1 %v1888_v47  ;;  %1670 = vmax.xlane.f32.xlu0 %v1669_v49 }
 0x294   : > { %v3789_v6 = vpop.eup %2927  ;;  %2939 = vpow2.f32 %v1785_v23  ;;  %v1617_v35 = vpop.xlane.xlu0 %1616 }
 0x295   : > { %v3791_v33 = vpop.eup %2929  ;;  %v1699_v36 = vsub.f32 %v3495_v2, %v1617_v35  ;;  %v1700_v12 = vsub.f32 %v3498_v13, %v1617_v35  ;;  %v1891_v25 = vadd.f32 %v3789_v6, %v3787_v42  ;;  %2671 = vmatpush3.bf16.msra.mxu0 %v2892_v46 }
 0x296   : > { %v3800_v41 = vpop.eup %2931  ;;  %v1620_v3 = vpop.xlane.xlu1 %1619 }
 0x297   : > { %v1787_v19 = vmul.f32 1.442695, %v1699_v36  ;;  %v1789_v60 = vmul.f32 1.442695, %v1700_v12  ;;  %v1701_v27 = vsub.f32 %v3501_v18, %v1620_v3  ;;  %v1702_v2 = vsub.f32 %v3504_v26, %v1620_v3  ;;  %1892 = vadd.xlane.f32.xlu0 %v1891_v25  ;;  %1673 = vmax.xlane.f32.xlu1 %v1672_v57 }
 0x298   : > { %v1894_v37 = vadd.f32 %v3800_v41, %v3791_v33 }
 0x299   : > { %2941 = vpow2.f32 %v1787_v19  ;;  %v1791_v13 = vmul.f32 1.442695, %v1701_v27  ;;  %v1793_v7 = vmul.f32 1.442695, %v1702_v2 }
 0x29a   : > { %2943 = vpow2.f32 %v1789_v60  ;;  %v4171_v60 = vld [vmem:[#allocation4_spill] sm:$0xff] }
 0x29b   : > { %v3807_v43 = vpop.eup %2933  ;;  %2945 = vpow2.f32 %v1791_v13  ;;  %1895 = vadd.xlane.f32.xlu1 %v1894_v37 }
 0x29c   : > { %v3809_v49 = vpop.eup %2935  ;;  %2947 = vpow2.f32 %v1793_v7  ;;  %v1623_v18 = vpop.xlane.xlu0 %1622 }
 0x29d   : > { %v3811_v26 = vpop.eup %2937  ;;  %v1703_v52 = vsub.f32 %v3511_v38, %v1623_v18  ;;  %v1704_v23 = vsub.f32 %v3514_v51, %v1623_v18  ;;  %v1897_v47 = vadd.f32 %v3809_v49, %v3807_v43 }
 0x29e   : > { %v3817_v58 = vpop.eup %2939  ;;  %v1626_v4 = vpop.xlane.xlu1 %1625 }
 0x29f   : > { %v1795_v35 = vmul.f32 1.442695, %v1703_v52  ;;  %v1797_v36 = vmul.f32 1.442695, %v1704_v23  ;;  %v1705_v12 = vsub.f32 %v3517_v54, %v1626_v4  ;;  %v1706_v25 = vsub.f32 %v3520_v59, %v1626_v4  ;;  %1898 = vadd.xlane.f32.xlu0 %v1897_v47  ;;  %v4170_v54 = vld [vmem:[#allocation3_spill] sm:$0xff]  ;;  %v4172_v52 = vld [vmem:[#allocation5_spill] sm:$0xff] }
 0x2a0   : > { %v1900_v57 = vadd.f32 %v3817_v58, %v3811_v26  ;;  %v4173_v47 = vld [vmem:[#allocation6_spill] sm:$0xff] }
 0x2a1   : > { %2949 = vpow2.f32 %v1795_v35  ;;  %v1799_v38 = vmul.f32 1.442695, %v1705_v12  ;;  %v1801_v48 = vmul.f32 1.442695, %v1706_v25 }
 0x2a2   : > { %2951 = vpow2.f32 %v1797_v36  ;;  %1901 = vadd.xlane.f32.xlu1 %v1900_v57 }
 0x2a3   : > { %v3823_v51 = vpop.eup %2941  ;;  %2953 = vpow2.f32 %v1799_v38 }
 0x2a4   : > { %v3825_v3 = vpop.eup %2943  ;;  %2955 = vpow2.f32 %v1801_v48  ;;  %v1629_v46 = vpop.xlane.xlu0 %1628 }
 0x2a5   : > { %v3827_v19 = vpop.eup %2945  ;;  %v1707_v59 = vsub.f32 %v4170_v54, %v1629_v46  ;;  %v1708_v27 = vsub.f32 %v4171_v60, %v1629_v46  ;;  %v1903_v2 = vadd.f32 %v3825_v3, %v3823_v51  ;;  %v4176_v46 = vld [vmem:[#allocation7_spill] sm:$0xff] }
 0x2a6   : > { %v3833_v13 = vpop.eup %2947  ;;  %v1632_v7 = vpop.xlane.xlu1 %1631 }
 0x2a7   : > { %v1803_v37 = vmul.f32 1.442695, %v1707_v59  ;;  %v1805_v18 = vmul.f32 1.442695, %v1708_v27  ;;  %v1709_v23 = vsub.f32 %v4172_v52, %v1632_v7  ;;  %v1710_v4 = vsub.f32 %v4173_v47, %v1632_v7  ;;  %1904 = vadd.xlane.f32.xlu0 %v1903_v2  ;;  %v4177_v59 = vld [vmem:[#allocation8_spill] sm:$0xff]  ;;  %v4179_v52 = vld [vmem:[#allocation9_spill] sm:$0xff] }
 0x2a8   : > { %v1906_v35 = vadd.f32 %v3833_v13, %v3827_v19  ;;  %v4180_v47 = vld [vmem:[#allocation10_spill] sm:$0xff] }
 0x2a9   : > { %2957 = vpow2.f32 %v1803_v37  ;;  %v1807_v36 = vmul.f32 1.442695, %v1709_v23  ;;  %v1809_v12 = vmul.f32 1.442695, %v1710_v4 }
 0x2aa   : > { %2959 = vpow2.f32 %v1805_v18  ;;  %1907 = vadd.xlane.f32.xlu1 %v1906_v35 }
 0x2ab   : > { %v3839_v25 = vpop.eup %2949  ;;  %2961 = vpow2.f32 %v1807_v36 }
 0x2ac   : > { %4174 = vst [vmem:[#allocation3_spill] sm:$0xff] %v3839_v25  ;;  %v3841_v57 = vpop.eup %2951  ;;  %2963 = vpow2.f32 %v1809_v12  ;;  %v1635_v38 = vpop.xlane.xlu0 %1634 }
 0x2ad   : > { %v3843_v48 = vpop.eup %2953  ;;  %v1711_v54 = vsub.f32 %v4176_v46, %v1635_v38  ;;  %v1712_v60 = vsub.f32 %v4177_v59, %v1635_v38  ;;  %v1909_v27 = vadd.f32 %v3841_v57, %v3839_v25  ;;  %v4188_v25 = vld [vmem:[#allocation14_spill] sm:$0xff] }
 0x2ae   : > { %4175 = vst [vmem:[#allocation4_spill] sm:$0xff] %v3843_v48  ;;  %v3849_v2 = vpop.eup %2955  ;;  %v1638_v7 = vpop.xlane.xlu1 %1637 }
 0x2af   : > { %4178 = vst [vmem:[#allocation5_spill] sm:$0xff] %v3849_v2  ;;  %v1811_v37 = vmul.f32 1.442695, %v1711_v54  ;;  %v1813_v18 = vmul.f32 1.442695, %v1712_v60  ;;  %v1713_v23 = vsub.f32 %v4179_v52, %v1638_v7  ;;  %v1714_v4 = vsub.f32 %v4180_v47, %v1638_v7  ;;  %1910 = vadd.xlane.f32.xlu0 %v1909_v27  ;;  %v4184_v60 = vld [vmem:[#allocation11_spill] sm:$0xff] }
 0x2b0   : > { %v1912_v35 = vadd.f32 %v3849_v2, %v3843_v48  ;;  %v4185_v27 = vld [vmem:[#allocation12_spill] sm:$0xff] }
 0x2b1   : > { %2965 = vpow2.f32 %v1811_v37  ;;  %v1815_v36 = vmul.f32 1.442695, %v1713_v23  ;;  %v1817_v12 = vmul.f32 1.442695, %v1714_v4 }
 0x2b2   : > { %2967 = vpow2.f32 %v1813_v18  ;;  %1913 = vadd.xlane.f32.xlu1 %v1912_v35  ;;  %v4187_v35 = vld [vmem:[#allocation13_spill] sm:$0xff] }
 0x2b3   : > { %v3855_v38 = vpop.eup %2957  ;;  %2969 = vpow2.f32 %v1815_v36 }
 0x2b4   : > { %4181 = vst [vmem:[#allocation6_spill] sm:$0xff] %v3855_v38  ;;  %v3857_v46 = vpop.eup %2959  ;;  %2971 = vpow2.f32 %v1817_v12  ;;  %v1641_v54 = vpop.xlane.xlu0 %1640 }
 0x2b5   : > { %4182 = vst [vmem:[#allocation7_spill] sm:$0xff] %v3857_v46  ;;  %v3859_v59 = vpop.eup %2961  ;;  %v1715_v7 = vsub.f32 %v4184_v60, %v1641_v54  ;;  %v1716_v52 = vsub.f32 %v4185_v27, %v1641_v54  ;;  %v1915_v37 = vadd.f32 %v3857_v46, %v3855_v38  ;;  %v4191_v38 = vld [vmem:[#allocation17_spill] sm:$0xff] }
 0x2b6   : > { %4183 = vst [vmem:[#allocation8_spill] sm:$0xff] %v3859_v59  ;;  %v3865_v23 = vpop.eup %2963  ;;  %v1644_v18 = vpop.xlane.xlu1 %1643 }
 0x2b7   : > { %4186 = vst [vmem:[#allocation9_spill] sm:$0xff] %v3865_v23  ;;  %v1819_v47 = vmul.f32 1.442695, %v1715_v7  ;;  %v1821_v4 = vmul.f32 1.442695, %v1716_v52  ;;  %v1717_v36 = vsub.f32 %v4187_v35, %v1644_v18  ;;  %v1718_v48 = vsub.f32 %v4188_v25, %v1644_v18  ;;  %1916 = vadd.xlane.f32.xlu0 %v1915_v37  ;;  %v4189_v35 = vld [vmem:[#allocation15_spill] sm:$0xff] }
 0x2b8   : > { %v1918_v12 = vadd.f32 %v3865_v23, %v3859_v59  ;;  %v4190_v37 = vld [vmem:[#allocation16_spill] sm:$0xff]  ;;  %v4192_v59 = vld [vmem:[#allocation18_spill] sm:$0xff] }
 0x2b9   : > { %2973 = vpow2.f32 %v1819_v47  ;;  %v1823_v60 = vmul.f32 1.442695, %v1717_v36  ;;  %v1825_v2 = vmul.f32 1.442695, %v1718_v48 }
 0x2ba   : > { %2975 = vpow2.f32 %v1821_v4  ;;  %1919 = vadd.xlane.f32.xlu1 %v1918_v12 }
 0x2bb   : > { %v3871_v54 = vpop.eup %2965  ;;  %2977 = vpow2.f32 %v1823_v60 }
 0x2bc   : > { %v3873_v27 = vpop.eup %2967  ;;  %2979 = vpow2.f32 %v1825_v2  ;;  %v1647_v7 = vpop.xlane.xlu0 %1646 }
 0x2bd   : > { %v3875_v52 = vpop.eup %2969  ;;  %v1719_v25 = vsub.f32 %v4189_v35, %v1647_v7  ;;  %v1720_v18 = vsub.f32 %v4190_v37, %v1647_v7  ;;  %v1921_v47 = vadd.f32 %v3873_v27, %v3871_v54 }
 0x2be   : > { %v3881_v36 = vpop.eup %2971  ;;  %v1650_v48 = vpop.xlane.xlu1 %1649 }
 0x2bf   : > { %v1827_v4 = vmul.f32 1.442695, %v1719_v25  ;;  %v1829_v12 = vmul.f32 1.442695, %v1720_v18  ;;  %v1721_v60 = vsub.f32 %v4191_v38, %v1650_v48  ;;  %v1722_v23 = vsub.f32 %v4192_v59, %v1650_v48  ;;  %1922 = vadd.xlane.f32.xlu0 %v1921_v47 }
 0x2c0   : > { %v1924_v2 = vadd.f32 %v3881_v36, %v3875_v52 }
 0x2c1   : > { %2981 = vpow2.f32 %v1827_v4  ;;  %v1831_v35 = vmul.f32 1.442695, %v1721_v60  ;;  %v1833_v46 = vmul.f32 1.442695, %v1722_v23 }
 0x2c2   : > { %2983 = vpow2.f32 %v1829_v12  ;;  %1925 = vadd.xlane.f32.xlu1 %v1924_v2 }
 0x2c3   : > { %v3887_v7 = vpop.eup %2973  ;;  %2985 = vpow2.f32 %v1831_v35 }
 0x2c4   : > { %4193 = vst [vmem:[#allocation10_spill] sm:$0xff] %v3887_v7  ;;  %v3889_v37 = vpop.eup %2975  ;;  %2987 = vpow2.f32 %v1833_v46 }
 0x2c5   : > { %v3891_v25 = vpop.eup %2977  ;;  %v1927_v38 = vadd.f32 %v3889_v37, %v3887_v7 }
 0x2c6   : > { %4194 = vst [vmem:[#allocation11_spill] sm:$0xff] %v3891_v25  ;;  %v3895_v59 = vpop.eup %2979 }
 0x2c7   : > { %4195 = vst [vmem:[#allocation12_spill] sm:$0xff] %v3895_v59  ;;  %1928 = vadd.xlane.f32.xlu0 %v1927_v38  ;;  %v1930_v18 = vadd.f32 %v3895_v59, %v3891_v25 }
 0x2c9   : > { %1931 = vadd.xlane.f32.xlu1 %v1930_v18 }
 0x2cb   : > { %v3899_v23 = vpop.eup %2981 }
 0x2cc   : > { %4196 = vst [vmem:[#allocation13_spill] sm:$0xff] %v3899_v23  ;;  %v3901_v47 = vpop.eup %2983 }
 0x2cd   : > { %4197 = vst [vmem:[#allocation14_spill] sm:$0xff] %v3901_v47  ;;  %v3903_v48 = vpop.eup %2985  ;;  %v1933_v46 = vadd.f32 %v3901_v47, %v3899_v23 }
 0x2ce   : > { %4198 = vst [vmem:[#allocation15_spill] sm:$0xff] %v3903_v48  ;;  %v3907_v4 = vpop.eup %2987 }
 0x2cf   : > { %4199 = vst [vmem:[#allocation16_spill] sm:$0xff] %v3907_v4  ;;  %1934 = vadd.xlane.f32.xlu0 %v1933_v46  ;;  %v1936_v12 = vadd.f32 %v3907_v4, %v3903_v48 }
 0x2d1   : > { %1937 = vadd.xlane.f32.xlu1 %v1936_v12 }
 0x304   : > { %v1869_v60 = vpop.xlane.xlu0 %1868 }
 0x305   : > { %2989 = vrcp.f32 %v1869_v60 }
 0x308   : > { %v1872_v2 = vpop.xlane.xlu1 %1871  ;;  %v1653_v35 = vpop.xlane.xlu0 %1652 }
 0x309   : > { %2991 = vrcp.f32 %v1872_v2  ;;  %v1723_v38 = vsub.f32 %v3644_v30, %v1653_v35  ;;  %v1724_v18 = vsub.f32 %v3647_v34, %v1653_v35 }
 0x30b   : > { %v1835_v7 = vmul.f32 1.442695, %v1723_v38  ;;  %v1837_v25 = vmul.f32 1.442695, %v1724_v18 }
 0x30c   : > { %v1875_v59 = vpop.xlane.xlu0 %1874  ;;  %v1656_v23 = vpop.xlane.xlu1 %1655 }
 0x30d   : > { %2993 = vpow2.f32 %v1835_v7  ;;  %v1725_v46 = vsub.f32 %v3661_v53, %v1656_v23  ;;  %v1726_v47 = vsub.f32 %v3665_v55, %v1656_v23 }
 0x30e   : > { %2995 = vpow2.f32 %v1837_v25 }
 0x30f   : > { %2997 = vrcp.f32 %v1875_v59  ;;  %v1839_v12 = vmul.f32 1.442695, %v1725_v46  ;;  %v1841_v60 = vmul.f32 1.442695, %v1726_v47  ;;  %v2990_v2 = vpop.eup %2989 }
 0x310   : > { %v1878_v48 = vpop.xlane.xlu1 %1877  ;;  %v1659_v4 = vpop.xlane.xlu0 %1658  ;;  %v1995_v53 = vmul.f32 %v2990_v2, %v3639_v22  ;;  %v1996_v23 = vmul.f32 %v2990_v2, %v3641_v44 }
 0x311   : > { %2999 = vpow2.f32 %v1839_v12  ;;  %v1727_v30 = vsub.f32 %v3677_v28, %v1659_v4  ;;  %v1728_v34 = vsub.f32 %v3681_v14, %v1659_v4 }
 0x312   : > { %3001 = vpow2.f32 %v1841_v60 }
 0x313   : > { %v2992_v35 = vpop.eup %2991  ;;  %3003 = vrcp.f32 %v1878_v48  ;;  %v1843_v7 = vmul.f32 1.442695, %v1727_v30  ;;  %v1845_v38 = vmul.f32 1.442695, %v1728_v34 }
 0x314   : > { %v1997_v55 = vmul.f32 %v2992_v35, %v3653_v50  ;;  %v1881_v25 = vpop.xlane.xlu0 %1880  ;;  %v1662_v59 = vpop.xlane.xlu1 %1661  ;;  %v1998_v47 = vmul.f32 %v2992_v35, %v3657_v56 }
 0x315   : > { %3005 = vpow2.f32 %v1843_v7  ;;  %v1729_v28 = vsub.f32 %v3697_v9, %v1662_v59  ;;  %v1730_v14 = vsub.f32 %v3701_v62, %v1662_v59 }
 0x316   : > { %3007 = vpow2.f32 %v1845_v38  ;;  %v2060_v4 = vpack.c.bf16 %v1998_v47, %v1996_v23  ;;  %v2059_v48 = vpack.c.bf16 %v1997_v55, %v1995_v53 }
 0x317   : > { %v3923_v18 = vpop.eup %2993  ;;  %3009 = vrcp.f32 %v1881_v25  ;;  %v1847_v22 = vmul.f32 1.442695, %v1729_v28  ;;  %v1849_v46 = vmul.f32 1.442695, %v1730_v14 }
 0x318   : > { %v3925_v50 = vpop.eup %2995  ;;  %2251 = vmatprep.mubr.bf16.mxu0 %v2060_v4  ;;  %v1884_v12 = vpop.xlane.xlu1 %1883 }
 0x319   : > { %v1665_v44 = vpop.xlane.xlu0 %1664  ;;  %v2998_v60 = vpop.eup %2997  ;;  %3011 = vpow2.f32 %v1847_v22  ;;  %2252 = vmatmul.mubr.bf16.vlgmr.msra.gmra.mrb[32].mxu0 %v2059_v48  ;;  %v1939_v62 = vadd.f32 %v3925_v50, %v3923_v18 }
 0x31a   : > { %v1731_v56 = vsub.f32 %v3713_v0, %v1665_v44  ;;  %v1732_v9 = vsub.f32 %v3717_v8, %v1665_v44  ;;  %3013 = vpow2.f32 %v1849_v46  ;;  %v2000_v53 = vmul.f32 %v2998_v60, %v3673_v16 }
 0x31b   : > { %v3931_v2 = vpop.eup %2999  ;;  %3015 = vrcp.f32 %v1884_v12  ;;  %1940 = vadd.xlane.f32.xlu0 %v1939_v62  ;;  %v1999_v23 = vmul.f32 %v2998_v60, %v3671_v61 }
 0x31c   : > { %v1851_v30 = vmul.f32 1.442695, %v1731_v56  ;;  %v1853_v34 = vmul.f32 1.442695, %v1732_v9  ;;  %v3933_v35 = vpop.eup %3001  ;;  %v1668_v38 = vpop.xlane.xlu1 %1667 }
 0x31d   : > { %v1887_v7 = vpop.xlane.xlu0 %1886  ;;  %v3004_v0 = vpop.eup %3003  ;;  %v1733_v8 = vsub.f32 %v3735_v29, %v1668_v38  ;;  %v1734_v55 = vsub.f32 %v3739_v40, %v1668_v38  ;;  %v1942_v25 = vadd.f32 %v3933_v35, %v3931_v2 }
 0x31e   : > { %3017 = vpow2.f32 %v1851_v30  ;;  %v2002_v59 = vmul.f32 %v3004_v0, %v3693_v5  ;;  %v2001_v47 = vmul.f32 %v3004_v0, %v3689_v15 }
 0x31f   : > { %3019 = vpow2.f32 %v1853_v34  ;;  %v3943_v28 = vpop.eup %3005  ;;  %v1855_v14 = vmul.f32 1.442695, %v1733_v8  ;;  %v1857_v16 = vmul.f32 1.442695, %v1734_v55  ;;  %1943 = vadd.xlane.f32.xlu1 %v1942_v25 }
 0x320   : > { %v3945_v4 = vpop.eup %3007  ;;  %3021 = vrcp.f32 %v1887_v7  ;;  %v2062_v29 = vpack.c.bf16 %v2002_v59, %v2000_v53  ;;  %v1890_v40 = vpop.xlane.xlu1 %1889  ;;  %v2061_v22 = vpack.c.bf16 %v2001_v47, %v1999_v23 }
 0x321   : > { %v1671_v48 = vpop.xlane.xlu0 %1670  ;;  %v3010_v46 = vpop.eup %3009  ;;  %3023 = vpow2.f32 %v1855_v14  ;;  %v1945_v15 = vadd.f32 %v3945_v4, %v3943_v28 }
 0x322   : > { %v1735_v5 = vsub.f32 %v3753_v11, %v1671_v48  ;;  %v1736_v61 = vsub.f32 %v3757_v17, %v1671_v48  ;;  %3025 = vpow2.f32 %v1857_v16  ;;  %2259 = vmatprep.mubr.bf16.mxu0 %v2062_v29  ;;  %v2004_v62 = vmul.f32 %v3010_v46, %v3709_v63 }
 0x323   : > { %v3951_v12 = vpop.eup %3011  ;;  %3027 = vrcp.f32 %v1890_v40  ;;  %2260 = vmatmul.mubr.bf16.gmra.mrb[36].mxu0 %v2061_v22  ;;  %1946 = vadd.xlane.f32.xlu0 %v1945_v15  ;;  %v2003_v53 = vmul.f32 %v3010_v46, %v3707_v1 }
 0x324   : > { %v1859_v44 = vmul.f32 1.442695, %v1735_v5  ;;  %v1861_v60 = vmul.f32 1.442695, %v1736_v61  ;;  %v3953_v56 = vpop.eup %3013  ;;  %v1674_v9 = vpop.xlane.xlu1 %1673 }
 0x325   : > { %v3016_v11 = vpop.eup %3015  ;;  %v1893_v17 = vpop.xlane.xlu0 %1892  ;;  %v1737_v30 = vsub.f32 %v3775_v45, %v1674_v9  ;;  %v1738_v34 = vsub.f32 %v3779_v24, %v1674_v9  ;;  %v1948_v7 = vadd.f32 %v3953_v56, %v3951_v12 }
 0x326   : > { %3029 = vpow2.f32 %v1859_v44  ;;  %v2006_v38 = vmul.f32 %v3016_v11, %v3729_v21  ;;  %v2005_v0 = vmul.f32 %v3016_v11, %v3720_v10 }
 0x327   : > { %3031 = vpow2.f32 %v1861_v60  ;;  %v1863_v63 = vmul.f32 1.442695, %v1737_v30  ;;  %v1865_v55 = vmul.f32 1.442695, %v1738_v34  ;;  %1949 = vadd.xlane.f32.xlu1 %v1948_v7 }
 0x328   : > { %v3963_v8 = vpop.eup %3017  ;;  %3033 = vrcp.f32 %v1893_v17  ;;  %v2064_v45 = vpack.c.bf16 %v2006_v38, %v2004_v62  ;;  %v1896_v24 = vpop.xlane.xlu1 %1895  ;;  %v2063_v59 = vpack.c.bf16 %v2005_v0, %v2003_v53 }
 0x329   : > { %v3965_v25 = vpop.eup %3019  ;;  %3035 = vpow2.f32 %v1863_v63 }
 0x32a   : > { %v1951_v23 = vadd.f32 %v3965_v25, %v3963_v8  ;;  %v3022_v21 = vpop.eup %3021  ;;  %3037 = vpow2.f32 %v1865_v55  ;;  %2267 = vmatprep.mubr.bf16.mxu0 %v2064_v45 }
 0x32b   : > { %v3969_v1 = vpop.eup %3023  ;;  %3039 = vrcp.f32 %v1896_v24  ;;  %2268 = vmatmul.mubr.bf16.gmra.mrb[40].mxu0 %v2063_v59  ;;  %v2008_v29 = vmul.f32 %v3022_v21, %v3749_v39  ;;  %v2007_v48 = vmul.f32 %v3022_v21, %v3747_v31 }
 0x32c   : > { %1952 = vadd.xlane.f32.xlu0 %v1951_v23  ;;  %v3971_v10 = vpop.eup %3025  ;;  %v1899_v47 = vpop.xlane.xlu0 %1898 }
 0x32d   : > { %v3028_v14 = vpop.eup %3027  ;;  %v1954_v16 = vadd.f32 %v3971_v10, %v3969_v1  ;;  %3041 = vrcp.f32 %v1899_v47 }
 0x32e   : > { %v2010_v40 = vmul.f32 %v3028_v14, %v3768_v20  ;;  %v2009_v22 = vmul.f32 %v3028_v14, %v3759_v32 }
 0x32f   : > { %1955 = vadd.xlane.f32.xlu1 %v1954_v16  ;;  %v1902_v5 = vpop.xlane.xlu1 %1901 }
 0x330   : > { %v3979_v46 = vpop.eup %3029  ;;  %3043 = vrcp.f32 %v1902_v5  ;;  %v2066_v15 = vpack.c.bf16 %v2010_v40, %v2008_v29  ;;  %v2065_v44 = vpack.c.bf16 %v2009_v22, %v2007_v48  ;;  %v4200_v5 = vld [vmem:[#allocation5_spill] sm:$0xff] }
 0x331   : > { %v3981_v61 = vpop.eup %3031 }
 0x332   : > { %v1957_v60 = vadd.f32 %v3981_v61, %v3979_v46  ;;  %v3034_v39 = vpop.eup %3033  ;;  %2275 = vmatprep.mubr.bf16.mxu0 %v2066_v15 }
 0x333   : > { %v3985_v9 = vpop.eup %3035  ;;  %2276 = vmatmul.mubr.bf16.gmra.mrb[44].mxu0 %v2065_v44  ;;  %v2012_v11 = vmul.f32 %v3034_v39, %v3789_v6  ;;  %v2011_v30 = vmul.f32 %v3034_v39, %v3787_v42  ;;  %v4201_v44 = vld [vmem:[#allocation4_spill] sm:$0xff]  ;;  %v4202_v39 = vld [vmem:[#allocation3_spill] sm:$0xff] }
 0x334   : > { %1958 = vadd.xlane.f32.xlu0 %v1957_v60  ;;  %v3987_v31 = vpop.eup %3037  ;;  %v1905_v32 = vpop.xlane.xlu0 %1904 }
 0x335   : > { %v3040_v20 = vpop.eup %3039  ;;  %v1960_v62 = vadd.f32 %v3987_v31, %v3985_v9  ;;  %3045 = vrcp.f32 %v1905_v32 }
 0x336   : > { %v2014_v17 = vmul.f32 %v3040_v20, %v3800_v41  ;;  %v2013_v34 = vmul.f32 %v3040_v20, %v3791_v33 }
 0x337   : > { %1961 = vadd.xlane.f32.xlu1 %v1960_v62  ;;  %v1908_v7 = vpop.xlane.xlu1 %1907  ;;  %v3042_v38 = vpop.eup %3041 }
 0x338   : > { %3047 = vrcp.f32 %v1908_v7  ;;  %v2068_v53 = vpack.c.bf16 %v2014_v17, %v2012_v11  ;;  %v2067_v0 = vpack.c.bf16 %v2013_v34, %v2011_v30  ;;  %v2016_v55 = vmul.f32 %v3042_v38, %v3809_v49  ;;  %v4203_v11 = vld [vmem:[#allocation7_spill] sm:$0xff]  ;;  %v4204_v30 = vld [vmem:[#allocation9_spill] sm:$0xff] }
 0x339   : > { %v2015_v33 = vmul.f32 %v3042_v38, %v3807_v43  ;;  %v4205_v38 = vld [vmem:[#allocation8_spill] sm:$0xff] }
 0x33a   : > { %v3044_v63 = vpop.eup %3043  ;;  %2283 = vmatprep.mubr.bf16.mxu0 %v2068_v53 }
 0x33b   : > { %2284 = vmatmul.mubr.bf16.gmra.mrb[48].mxu0 %v2067_v0  ;;  %v2018_v6 = vmul.f32 %v3044_v63, %v3817_v58  ;;  %v2017_v41 = vmul.f32 %v3044_v63, %v3811_v26  ;;  %v4206_v63 = vld [vmem:[#allocation6_spill] sm:$0xff] }
 0x33c   : > { %v1911_v45 = vpop.xlane.xlu0 %1910 }
 0x33d   : > { %v2070_v24 = vpack.c.bf16 %v2018_v6, %v2016_v55  ;;  %3049 = vrcp.f32 %v1911_v45  ;;  %v2069_v23 = vpack.c.bf16 %v2017_v41, %v2015_v33 }
 0x33f   : > { %2291 = vmatprep.mubr.bf16.mxu0 %v2070_v24  ;;  %v1914_v42 = vpop.xlane.xlu1 %1913  ;;  %v3046_v59 = vpop.eup %3045 }
 0x340   : > { %3051 = vrcp.f32 %v1914_v42  ;;  %v2020_v47 = vmul.f32 %v3046_v59, %v3825_v3  ;;  %v2019_v29 = vmul.f32 %v3046_v59, %v3823_v51 }
 0x342   : > { %v3048_v21 = vpop.eup %3047 }
 0x343   : > { %2292 = vmatmul.mubr.bf16.gmra.mrb[52].mxu0 %v2069_v23  ;;  %v2022_v49 = vmul.f32 %v3048_v21, %v3833_v13  ;;  %v2021_v16 = vmul.f32 %v3048_v21, %v3827_v19 }
 0x344   : > { %v1917_v14 = vpop.xlane.xlu0 %1916 }
 0x345   : > { %v2072_v58 = vpack.c.bf16 %v2022_v49, %v2020_v47  ;;  %3053 = vrcp.f32 %v1917_v14  ;;  %v2071_v43 = vpack.c.bf16 %v2021_v16, %v2019_v29 }
 0x347   : > { %2299 = vmatprep.mubr.bf16.mxu0 %v2072_v58  ;;  %v1920_v26 = vpop.xlane.xlu1 %1919  ;;  %v3050_v40 = vpop.eup %3049 }
 0x348   : > { %3055 = vrcp.f32 %v1920_v26  ;;  %v2024_v22 = vmul.f32 %v3050_v40, %v3841_v57  ;;  %v2023_v32 = vmul.f32 %v3050_v40, %v4202_v39  ;;  %v4207_v26 = vld [vmem:[#allocation12_spill] sm:$0xff] }
 0x34a   : > { %v3052_v48 = vpop.eup %3051 }
 0x34b   : > { %2300 = vmatmul.mubr.bf16.gmra.mrb[56].mxu0 %v2071_v43  ;;  %v2026_v3 = vmul.f32 %v3052_v48, %v4200_v5  ;;  %v2025_v60 = vmul.f32 %v3052_v48, %v4201_v44  ;;  %v4209_v48 = vld [vmem:[#allocation10_spill] sm:$0xff] }
 0x34c   : > { %v1923_v15 = vpop.xlane.xlu0 %1922 }
 0x34d   : > { %v2074_v13 = vpack.c.bf16 %v2026_v3, %v2024_v22  ;;  %3057 = vrcp.f32 %v1923_v15  ;;  %v2073_v51 = vpack.c.bf16 %v2025_v60, %v2023_v32  ;;  %v4210_v3 = vld [vmem:[#allocation14_spill] sm:$0xff]  ;;  %v4212_v60 = vld [vmem:[#allocation15_spill] sm:$0xff] }
 0x34f   : > { %2307 = vmatprep.mubr.bf16.mxu0 %v2074_v13  ;;  %v1926_v19 = vpop.xlane.xlu1 %1925  ;;  %v3054_v20 = vpop.eup %3053  ;;  %v4211_v13 = vld [vmem:[#allocation16_spill] sm:$0xff] }
 0x350   : > { %3059 = vrcp.f32 %v1926_v19  ;;  %v2028_v17 = vmul.f32 %v3054_v20, %v4203_v11  ;;  %v2027_v55 = vmul.f32 %v3054_v20, %v4206_v63  ;;  %v4213_v19 = vld [vmem:[#allocation13_spill] sm:$0xff] }
 0x352   : > { %v3056_v62 = vpop.eup %3055 }
 0x353   : > { %2308 = vmatmul.mubr.bf16.gmra.mrb[60].mxu0 %v2073_v51  ;;  %v2030_v57 = vmul.f32 %v3056_v62, %v4204_v30  ;;  %v2029_v53 = vmul.f32 %v3056_v62, %v4205_v38 }
 0x354   : > { %v1929_v34 = vpop.xlane.xlu0 %1928 }
 0x355   : > { %3061 = vrcp.f32 %v1929_v34  ;;  %v2076_v7 = vpack.c.bf16 %v2030_v57, %v2028_v17  ;;  %v2075_v45 = vpack.c.bf16 %v2029_v53, %v2027_v55 }
 0x356   : > { %v1932_v0 = vpop.xlane.xlu1 %1931 }
 0x357   : > { %2315 = vmatprep.mubr.bf16.mxu0 %v2076_v7  ;;  %3063 = vrcp.f32 %v1932_v0  ;;  %v3058_v6 = vpop.eup %3057 }
 0x358   : > { %v2032_v41 = vmul.f32 %v3058_v6, %v3873_v27  ;;  %v2031_v49 = vmul.f32 %v3058_v6, %v3871_v54 }
 0x35a   : > { %v3060_v24 = vpop.eup %3059 }
 0x35b   : > { %2316 = vmatmul.mubr.bf16.gmra.mrb[64].mxu0 %v2075_v45  ;;  %v2034_v42 = vmul.f32 %v3060_v24, %v3881_v36  ;;  %v2033_v23 = vmul.f32 %v3060_v24, %v3875_v52  ;;  %v4208_v36 = vld [vmem:[#allocation11_spill] sm:$0xff] }
 0x35c   : > { %v1935_v33 = vpop.xlane.xlu0 %1934 }
 0x35d   : > { %3065 = vrcp.f32 %v1935_v33  ;;  %v2078_v59 = vpack.c.bf16 %v2034_v42, %v2032_v41  ;;  %v2077_v58 = vpack.c.bf16 %v2033_v23, %v2031_v49 }
 0x35e   : > { %v1938_v21 = vpop.xlane.xlu1 %1937 }
 0x35f   : > { %v3062_v47 = vpop.eup %3061  ;;  %2323 = vmatprep.mubr.bf16.mxu0 %v2078_v59  ;;  %3067 = vrcp.f32 %v1938_v21 }
 0x360   : > { %v2036_v16 = vmul.f32 %v3062_v47, %v3889_v37  ;;  %v2035_v52 = vmul.f32 %v3062_v47, %v4209_v48 }
 0x361   : > { %v3064_v14 = vpop.eup %3063 }
 0x362   : > { %v2038_v29 = vmul.f32 %v3064_v14, %v4207_v26  ;;  %v2037_v40 = vmul.f32 %v3064_v14, %v4208_v36 }
 0x363   : > { %2324 = vmatmul.mubr.bf16.gmra.mrb[68].mxu0 %v2077_v58 }
 0x364   : > { %v2080_v27 = vpack.c.bf16 %v2038_v29, %v2036_v16  ;;  %v2079_v5 = vpack.c.bf16 %v2037_v40, %v2035_v52 }
 0x366   : > { %2331 = vmatprep.mubr.bf16.mxu0 %v2080_v27 }
 0x367   : > { %v3066_v43 = vpop.eup %3065 }
 0x368   : > { %v2040_v15 = vmul.f32 %v3066_v43, %v4210_v3  ;;  %v2039_v39 = vmul.f32 %v3066_v43, %v4213_v19 }
 0x369   : > { %v3068_v22 = vpop.eup %3067 }
 0x36a   : > { %v2042_v54 = vmul.f32 %v3068_v22, %v4211_v13  ;;  %v2041_v37 = vmul.f32 %v3068_v22, %v4212_v60 }
 0x36b   : > { %2332 = vmatmul.mubr.bf16.gmra.mrb[72].mxu0 %v2079_v5 }
 0x36c   : > { %v2082_v44 = vpack.c.bf16 %v2042_v54, %v2040_v15  ;;  %v2081_v32 = vpack.c.bf16 %v2041_v37, %v2039_v39 }
 0x36e   : > { %2339 = vmatprep.mubr.bf16.mxu0 %v2082_v44 }
 0x373   : > { %2340 = vmatmul.mubr.bf16.gmra.mrb[76].mxu0 %v2081_v32 }
 0x3a8   : > { %v1941_v20 = vpop.xlane.xlu0 %1940 }
 0x3a9   : > { %3069 = vrcp.f32 %v1941_v20 }
 0x3ac   : > { %v1944_v51 = vpop.xlane.xlu1 %1943 }
 0x3ad   : > { %3071 = vrcp.f32 %v1944_v51 }
 0x3b0   : > { %v1947_v62 = vpop.xlane.xlu0 %1946 }
 0x3b1   : > { %3073 = vrcp.f32 %v1947_v62 }
 0x3b3   : > { %v3070_v17 = vpop.eup %3069 }
 0x3b4   : > { %v1950_v11 = vpop.xlane.xlu1 %1949  ;;  %v2044_v34 = vmul.f32 %v3070_v17, %v3925_v50  ;;  %v2043_v38 = vmul.f32 %v3070_v17, %v3923_v18 }
 0x3b5   : > { %3075 = vrcp.f32 %v1950_v11 }
 0x3b7   : > { %v3072_v30 = vpop.eup %3071 }
 0x3b8   : > { %v2046_v7 = vmul.f32 %v3072_v30, %v3933_v35  ;;  %v2045_v53 = vmul.f32 %v3072_v30, %v3931_v2 }
 0x3b9   : > { %v1953_v57 = vpop.xlane.xlu0 %1952 }
 0x3ba   : > { %v2084_v0 = vpack.c.bf16 %v2046_v7, %v2044_v34  ;;  %v2083_v63 = vpack.c.bf16 %v2045_v53, %v2043_v38  ;;  %3077 = vrcp.f32 %v1953_v57 }
 0x3bb   : > { %v3074_v6 = vpop.eup %3073 }
 0x3bc   : > { %2347 = vmatprep.mubr.bf16.mxu0 %v2084_v0  ;;  %v1956_v55 = vpop.xlane.xlu1 %1955  ;;  %v2048_v41 = vmul.f32 %v3074_v6, %v3945_v4  ;;  %v2047_v35 = vmul.f32 %v3074_v6, %v3943_v28 }
 0x3bd   : > { %3079 = vrcp.f32 %v1956_v55  ;;  %2348 = vmatmul.mubr.bf16.gmra.mrb[80].mxu0 %v2083_v63 }
 0x3bf   : > { %v3076_v45 = vpop.eup %3075 }
 0x3c0   : > { %v2050_v50 = vmul.f32 %v3076_v45, %v3953_v56  ;;  %v2049_v18 = vmul.f32 %v3076_v45, %v3951_v12 }
 0x3c1   : > { %v1959_v24 = vpop.xlane.xlu0 %1958 }
 0x3c2   : > { %v2086_v42 = vpack.c.bf16 %v2050_v50, %v2048_v41  ;;  %v2085_v2 = vpack.c.bf16 %v2049_v18, %v2047_v35  ;;  %3081 = vrcp.f32 %v1959_v24 }
 0x3c4   : > { %2355 = vmatprep.mubr.bf16.mxu0 %v2086_v42  ;;  %v1962_v33 = vpop.xlane.xlu1 %1961  ;;  %v3078_v59 = vpop.eup %3077 }
 0x3c5   : > { %3083 = vrcp.f32 %v1962_v33  ;;  %2356 = vmatmul.mubr.bf16.gmra.mrb[84].mxu0 %v2085_v2  ;;  %v2052_v21 = vmul.f32 %v3078_v59, %v3965_v25  ;;  %v2051_v4 = vmul.f32 %v3078_v59, %v3963_v8 }
 0x3c7   : > { %v3080_v23 = vpop.eup %3079 }
 0x3c8   : > { %v2054_v47 = vmul.f32 %v3080_v23, %v3971_v10  ;;  %v2053_v28 = vmul.f32 %v3080_v23, %v3969_v1 }
 0x3ca   : > { %v2088_v56 = vpack.c.bf16 %v2054_v47, %v2052_v21  ;;  %v2087_v12 = vpack.c.bf16 %v2053_v28, %v2051_v4 }
 0x3cc   : > { %2363 = vmatprep.mubr.bf16.mxu0 %v2088_v56  ;;  %v3082_v49 = vpop.eup %3081 }
 0x3cd   : > { %2364 = vmatmul.mubr.bf16.gmra.mrb[88].mxu0 %v2087_v12  ;;  %v2056_v58 = vmul.f32 %v3082_v49, %v3981_v61  ;;  %v2055_v26 = vmul.f32 %v3082_v49, %v3979_v46 }
 0x3cf   : > { %v3084_v14 = vpop.eup %3083 }
 0x3d0   : > { %v2058_v16 = vmul.f32 %v3084_v14, %v3987_v31  ;;  %v2057_v25 = vmul.f32 %v3084_v14, %v3985_v9 }
 0x3d2   : > { %v2090_v10 = vpack.c.bf16 %v2058_v16, %v2056_v58  ;;  %v2089_v29 = vpack.c.bf16 %v2057_v25, %v2055_v26 }
 0x3d4   : > { %2371 = vmatprep.mubr.bf16.mxu0 %v2090_v10 }
 0x3d5   : > { %2372 = vmatmul.mubr.bf16.gmra.mrb[92].mxu0 %v2089_v29 }
 0x3ec   : > { %v2672_v8 = vpop.f32.mrb[32].mxu0 }
 0x3ed   : > { %v2673_v1 = vpop.f32.mrb[33].mxu0 }
 0x3ee   : > { %v2674_v46 = vadd.f32 %v2673_v1, %v2672_v8  ;;  %v2675_v61 = vpop.f32.mrb[34].mxu0 }
 0x3ef   : > { %v2676_v9 = vpop.f32.mrb[35].mxu0 }
 0x3f0   : > { %2381 = vst.msk [vmem:[%s4043_s22] sm:$0xff] %vm2380_vm1, %v2674_v46  ;;  %v2677_v31 = vadd.f32 %v2676_v9, %v2675_v61 }
 0x3f2   : > { %2382 = vst.msk [vmem:[%s4043_s22 + $0x8] sm:$0xff] %vm2380_vm1, %v2677_v31 }
 0x3f6   : > { %v2678_v27 = vpop.f32.mrb[36].mxu0 }
 0x3f7   : > { %v2679_v36 = vpop.f32.mrb[37].mxu0 }
 0x3f8   : > { %v2680_v40 = vadd.f32 %v2679_v36, %v2678_v27  ;;  %v2681_v43 = vpop.f32.mrb[38].mxu0 }
 0x3f9   : > { %v2682_v48 = vpop.f32.mrb[39].mxu0 }
 0x3fa   : > { %2383 = vst.msk [vmem:[%s4043_s22 + $0x10] sm:$0xff] %vm2380_vm1, %v2680_v40  ;;  %v2683_v52 = vadd.f32 %v2682_v48, %v2681_v43 }
 0x3fc   : > { %2384 = vst.msk [vmem:[%s4043_s22 + $0x18] sm:$0xff] %vm2380_vm1, %v2683_v52 }
 0x3fe   : > { %v2684_v22 = vpop.f32.mrb[40].mxu0 }
 0x3ff   : > { %v2685_v5 = vpop.f32.mrb[41].mxu0 }
 0x400   : > { %v2686_v3 = vadd.f32 %v2685_v5, %v2684_v22  ;;  %v2687_v15 = vpop.f32.mrb[42].mxu0 }
 0x401   : > { %v2688_v13 = vpop.f32.mrb[43].mxu0 }
 0x402   : > { %2385 = vst.msk [vmem:[%s4043_s22 + $0x20] sm:$0xff] %vm2380_vm1, %v2686_v3  ;;  %v2689_v54 = vadd.f32 %v2688_v13, %v2687_v15 }
 0x404   : > { %2386 = vst.msk [vmem:[%s4043_s22 + $0x28] sm:$0xff] %vm2380_vm1, %v2689_v54 }
 0x406   : > { %v2690_v44 = vpop.f32.mrb[44].mxu0 }
 0x407   : > { %v2691_v60 = vpop.f32.mrb[45].mxu0 }
 0x408   : > { %v2692_v37 = vadd.f32 %v2691_v60, %v2690_v44  ;;  %v2693_v19 = vpop.f32.mrb[46].mxu0 }
 0x409   : > { %v2694_v39 = vpop.f32.mrb[47].mxu0 }
 0x40a   : > { %2387 = vst.msk [vmem:[%s4043_s22 + $0x30] sm:$0xff] %vm2380_vm1, %v2692_v37  ;;  %v2695_v32 = vadd.f32 %v2694_v39, %v2693_v19 }
 0x40c   : > { %2388 = vst.msk [vmem:[%s4043_s22 + $0x38] sm:$0xff] %vm2380_vm1, %v2695_v32 }
 0x40e   : > { %v2696_v20 = vpop.f32.mrb[48].mxu0 }
 0x40f   : > { %v2697_v51 = vpop.f32.mrb[49].mxu0 }
 0x410   : > { %v2698_v62 = vadd.f32 %v2697_v51, %v2696_v20  ;;  %v2699_v11 = vpop.f32.mrb[50].mxu0 }
 0x411   : > { %v2700_v17 = vpop.f32.mrb[51].mxu0 }
 0x412   : > { %2389 = vst.msk [vmem:[%s4043_s22 + $0x40] sm:$0xff] %vm2380_vm1, %v2698_v62  ;;  %v2701_v30 = vadd.f32 %v2700_v17, %v2699_v11 }
 0x414   : > { %2390 = vst.msk [vmem:[%s4043_s22 + $0x48] sm:$0xff] %vm2380_vm1, %v2701_v30 }
 0x416   : > { %v2702_v57 = vpop.f32.mrb[52].mxu0 }
 0x417   : > { %v2703_v34 = vpop.f32.mrb[53].mxu0 }
 0x418   : > { %v2704_v7 = vadd.f32 %v2703_v34, %v2702_v57  ;;  %v2705_v38 = vpop.f32.mrb[54].mxu0 }
 0x419   : > { %v2706_v53 = vpop.f32.mrb[55].mxu0 }
 0x41a   : > { %2391 = vst.msk [vmem:[%s4043_s22 + $0x50] sm:$0xff] %vm2380_vm1, %v2704_v7  ;;  %v2707_v0 = vadd.f32 %v2706_v53, %v2705_v38 }
 0x41c   : > { %2392 = vst.msk [vmem:[%s4043_s22 + $0x58] sm:$0xff] %vm2380_vm1, %v2707_v0 }
 0x41e   : > { %v2708_v63 = vpop.f32.mrb[56].mxu0 }
 0x41f   : > { %v2709_v55 = vpop.f32.mrb[57].mxu0 }
 0x420   : > { %v2710_v6 = vadd.f32 %v2709_v55, %v2708_v63  ;;  %v2711_v45 = vpop.f32.mrb[58].mxu0 }
 0x421   : > { %v2712_v24 = vpop.f32.mrb[59].mxu0 }
 0x422   : > { %2393 = vst.msk [vmem:[%s4043_s22 + $0x60] sm:$0xff] %vm2380_vm1, %v2710_v6  ;;  %v2713_v41 = vadd.f32 %v2712_v24, %v2711_v45 }
 0x424   : > { %2394 = vst.msk [vmem:[%s4043_s22 + $0x68] sm:$0xff] %vm2380_vm1, %v2713_v41 }
 0x426   : > { %v2714_v50 = vpop.f32.mrb[60].mxu0 }
 0x427   : > { %v2715_v35 = vpop.f32.mrb[61].mxu0 }
 0x428   : > { %v2716_v18 = vadd.f32 %v2715_v35, %v2714_v50  ;;  %v2717_v42 = vpop.f32.mrb[62].mxu0 }
 0x429   : > { %v2718_v2 = vpop.f32.mrb[63].mxu0 }
 0x42a   : > { %2395 = vst.msk [vmem:[%s4043_s22 + $0x70] sm:$0xff] %vm2380_vm1, %v2716_v18  ;;  %v2719_v33 = vadd.f32 %v2718_v2, %v2717_v42 }
 0x42c   : > { %2396 = vst.msk [vmem:[%s4043_s22 + $0x78] sm:$0xff] %vm2380_vm1, %v2719_v33 }
 0x42e   : > { %v2720_v59 = vpop.f32.mrb[64].mxu0 }
 0x42f   : > { %v2721_v23 = vpop.f32.mrb[65].mxu0 }
 0x430   : > { %v2722_v21 = vadd.f32 %v2721_v23, %v2720_v59  ;;  %v2723_v47 = vpop.f32.mrb[66].mxu0 }
 0x431   : > { %v2724_v4 = vpop.f32.mrb[67].mxu0 }
 0x432   : > { %2397 = vst.msk [vmem:[%s4043_s22 + $0x80] sm:$0xff] %vm2380_vm1, %v2722_v21  ;;  %v2725_v28 = vadd.f32 %v2724_v4, %v2723_v47 }
 0x434   : > { %2398 = vst.msk [vmem:[%s4043_s22 + $0x88] sm:$0xff] %vm2380_vm1, %v2725_v28 }
 0x436   : > { %v2726_v56 = vpop.f32.mrb[68].mxu0 }
 0x437   : > { %v2727_v12 = vpop.f32.mrb[69].mxu0 }
 0x438   : > { %v2728_v49 = vadd.f32 %v2727_v12, %v2726_v56  ;;  %v2729_v14 = vpop.f32.mrb[70].mxu0 }
 0x439   : > { %v2730_v58 = vpop.f32.mrb[71].mxu0 }
 0x43a   : > { %2399 = vst.msk [vmem:[%s4043_s22 + $0x90] sm:$0xff] %vm2380_vm1, %v2728_v49  ;;  %v2731_v16 = vadd.f32 %v2730_v58, %v2729_v14 }
 0x43c   : > { %2400 = vst.msk [vmem:[%s4043_s22 + $0x98] sm:$0xff] %vm2380_vm1, %v2731_v16 }
 0x43e   : > { %v2732_v26 = vpop.f32.mrb[72].mxu0 }
 0x43f   : > { %v2733_v25 = vpop.f32.mrb[73].mxu0 }
 0x440   : > { %v2734_v10 = vadd.f32 %v2733_v25, %v2732_v26  ;;  %v2735_v29 = vpop.f32.mrb[74].mxu0 }
 0x441   : > { %v2736_v8 = vpop.f32.mrb[75].mxu0 }
 0x442   : > { %2401 = vst.msk [vmem:[%s4043_s22 + $0xa0] sm:$0xff] %vm2380_vm1, %v2734_v10  ;;  %v2737_v1 = vadd.f32 %v2736_v8, %v2735_v29 }
 0x444   : > { %2402 = vst.msk [vmem:[%s4043_s22 + $0xa8] sm:$0xff] %vm2380_vm1, %v2737_v1 }
 0x446   : > { %v2738_v46 = vpop.f32.mrb[76].mxu0 }
 0x447   : > { %v2739_v61 = vpop.f32.mrb[77].mxu0 }
 0x448   : > { %v2740_v9 = vadd.f32 %v2739_v61, %v2738_v46  ;;  %v2741_v31 = vpop.f32.mrb[78].mxu0 }
 0x449   : > { %v2742_v27 = vpop.f32.mrb[79].mxu0 }
 0x44a   : > { %2403 = vst.msk [vmem:[%s4043_s22 + $0xb0] sm:$0xff] %vm2380_vm1, %v2740_v9  ;;  %v2743_v36 = vadd.f32 %v2742_v27, %v2741_v31 }
 0x44c   : > { %2404 = vst.msk [vmem:[%s4043_s22 + $0xb8] sm:$0xff] %vm2380_vm1, %v2743_v36 }
 0x490   : > { %v2744_v40 = vpop.f32.mrb[80].mxu0 }
 0x491   : > { %v2745_v43 = vpop.f32.mrb[81].mxu0 }
 0x492   : > { %v2746_v48 = vadd.f32 %v2745_v43, %v2744_v40  ;;  %v2747_v52 = vpop.f32.mrb[82].mxu0 }
 0x493   : > { %v2748_v22 = vpop.f32.mrb[83].mxu0 }
 0x494   : > { %2405 = vst.msk [vmem:[%s4043_s22 + $0xc0] sm:$0xff] %vm2380_vm1, %v2746_v48  ;;  %v2749_v5 = vadd.f32 %v2748_v22, %v2747_v52 }
 0x496   : > { %2406 = vst.msk [vmem:[%s4043_s22 + $0xc8] sm:$0xff] %vm2380_vm1, %v2749_v5 }
 0x498   : > { %v2750_v3 = vpop.f32.mrb[84].mxu0 }
 0x499   : > { %v2751_v15 = vpop.f32.mrb[85].mxu0 }
 0x49a   : > { %v2752_v13 = vadd.f32 %v2751_v15, %v2750_v3  ;;  %v2753_v54 = vpop.f32.mrb[86].mxu0 }
 0x49b   : > { %v2754_v44 = vpop.f32.mrb[87].mxu0 }
 0x49c   : > { %2407 = vst.msk [vmem:[%s4043_s22 + $0xd0] sm:$0xff] %vm2380_vm1, %v2752_v13  ;;  %v2755_v60 = vadd.f32 %v2754_v44, %v2753_v54 }
 0x49e   : > { %2408 = vst.msk [vmem:[%s4043_s22 + $0xd8] sm:$0xff] %vm2380_vm1, %v2755_v60 }
 0x4a0   : > { %v2756_v37 = vpop.f32.mrb[88].mxu0 }
 0x4a1   : > { %v2757_v19 = vpop.f32.mrb[89].mxu0 }
 0x4a2   : > { %v2758_v39 = vadd.f32 %v2757_v19, %v2756_v37  ;;  %v2759_v32 = vpop.f32.mrb[90].mxu0 }
 0x4a3   : > { %v2760_v20 = vpop.f32.mrb[91].mxu0 }
 0x4a4   : > { %2409 = vst.msk [vmem:[%s4043_s22 + $0xe0] sm:$0xff] %vm2380_vm1, %v2758_v39  ;;  %v2761_v51 = vadd.f32 %v2760_v20, %v2759_v32 }
 0x4a6   : > { %2410 = vst.msk [vmem:[%s4043_s22 + $0xe8] sm:$0xff] %vm2380_vm1, %v2761_v51 }
 0x4a8   : > { %v2762_v62 = vpop.f32.mrb[92].mxu0 }
 0x4a9   : > { %v2763_v11 = vpop.f32.mrb[93].mxu0 }
 0x4aa   : > { %v2764_v17 = vadd.f32 %v2763_v11, %v2762_v62  ;;  %v2765_v30 = vpop.f32.mrb[94].mxu0 }
 0x4ab   : > { %v2766_v57 = vpop.f32.mrb[95].mxu0 }
 0x4ac   : > { %2411 = vst.msk [vmem:[%s4043_s22 + $0xf0] sm:$0xff] %vm2380_vm1, %v2764_v17  ;;  %v2767_v34 = vadd.f32 %v2766_v57, %v2765_v30 }
 0x4ae   : > { %2412 = vst.msk [vmem:[%s4043_s22 + $0xf8] sm:$0xff] %vm2380_vm1, %v2767_v34 }
 0x4af PF: > { %s15_s20 = sadd.s32 1, %s3107_s20   ;;  %s4214_s18 = smov %s3103_s19 }
 0x4b0   : > { %p12_p5 = scmp.ge.s32.totalorder %s15_s20, 4   ;;  %s4215_s19 = smov %s4217_s21 }
 0x4b2   :  { %14 = sbr.rel (!%p12_p5) target bundleno = 2 (0x2), region = 91 }

</bundles_post_ra>
